<compile_context>
chip_gen: v7x
topology: tpu7x:2x2x1
jax: 0.10.0
libtpu: 0.0.40
codegen_flags: <defaults>
</compile_context>

<pallas_src>
import numpy as np
import jax
import jax.numpy as jnp
from jax.experimental import pallas as pl
from jax.experimental.pallas import tpu as pltpu

H = 768       # BERT hidden size (module hard-codes 768 * 2 in nn.Linear)
HID = 512     # hidden width of the head
NCLS = 4      # {'O', 'Place', 'Person', 'Organisation'}
LANE = 128    # lane-dense padded class dim
TBS = 128     # token-tile size (tokens streamed per grid step)


# --------------------------------------------------------------------------
# Fused head kernel (one pallas_call):
#   grid axis t = token tiles (reduction, "arbitrary")
#     every step : acc[k, :] += sum_{tokens in tile with sid==k} hidden[token, :]
#     last step  : mean = acc * inv_count
#                  h      = relu(cls@W1_top + mean@W1_bot + b1)
#                  logits = h @ W2_pad + b2_pad   (pad lanes biased to -1e30)
#                  probs  = softmax(logits, axis=1)   (exact divide)
# Dropout(p=0.5) is eval-mode identity.
# --------------------------------------------------------------------------
def ner_head_kernel(sid_ref, hid_ref, cls_ref, invc_ref,
                    w1t_ref, w1b_ref, b1_ref, w2_ref, b2_ref,
                    probs_ref, acc_ref):
    t = pl.program_id(0)
    kpad = acc_ref.shape[0]
    tbs = sid_ref.shape[1]

    @pl.when(t == 0)
    def _init():
        acc_ref[...] = jnp.zeros_like(acc_ref)

    # Segment-sum over this token tile: one-hot built in-kernel from the int32
    # sentence ids (no pooling-matrix DMA), one bf16 MXU dot, f32 accumulation.
    sid = sid_ref[...]                                            # (1, TBS) int32
    row_ids = jax.lax.broadcasted_iota(jnp.int32, (kpad, tbs), 0)
    onehot = jnp.where(sid == row_ids, 1.0, 0.0).astype(jnp.bfloat16)
    acc_ref[...] += jnp.dot(onehot, hid_ref[...],
                            preferred_element_type=jnp.float32)

    # Epilogue only on the final token tile.
    @pl.when(t == pl.num_programs(0) - 1)
    def _epilogue():
        mean = acc_ref[...] * invc_ref[...]                       # (KPAD, H) f32
        h = jnp.dot(cls_ref[...], w1t_ref[...],
                    preferred_element_type=jnp.float32)
        h = h + jnp.dot(mean.astype(jnp.bfloat16), w1b_ref[...],
                        preferred_element_type=jnp.float32)
        h = h + b1_ref[...]
        # TODO(synk): nn.Dropout(p=0.5) treated as eval-mode identity (no RNG match).
        h = jnp.maximum(h, 0.0)                                   # ReLU (f32)

        logits = jnp.dot(h.astype(jnp.bfloat16), w2_ref[...],
                         preferred_element_type=jnp.float32)
        logits = logits + b2_ref[...]        # pad lanes carry -1e30 -> exp == 0

        # Softmax(dim=1) in f32 with an EXACT divide (matches the reference).
        m = jnp.max(logits, axis=1, keepdims=True)
        e = jnp.exp(logits - m)
        probs_ref[...] = e / jnp.sum(e, axis=1, keepdims=True)


def ner_head(sid_pad, hidden_pad, cls_pad, invc, params):
    kpad = cls_pad.shape[0]
    bs_pad = hidden_pad.shape[0]
    num_tiles = bs_pad // TBS
    return pl.pallas_call(
        ner_head_kernel,
        out_shape=jax.ShapeDtypeStruct((kpad, LANE), jnp.float32),
        grid=(num_tiles,),
        in_specs=[
            pl.BlockSpec((1, TBS), lambda t: (0, t)),       # sid (tiled tokens)
            pl.BlockSpec((TBS, H), lambda t: (t, 0)),       # hidden (tiled tokens)
            pl.BlockSpec((kpad, H), lambda t: (0, 0)),      # cls rows
            pl.BlockSpec((kpad, 1), lambda t: (0, 0)),      # 1/count per sentence
            pl.BlockSpec((H, HID), lambda t: (0, 0)),       # W1_top (bf16)
            pl.BlockSpec((H, HID), lambda t: (0, 0)),       # W1_bot (bf16)
            pl.BlockSpec((1, HID), lambda t: (0, 0)),       # b1 (f32)
            pl.BlockSpec((HID, LANE), lambda t: (0, 0)),    # W2_pad (bf16)
            pl.BlockSpec((1, LANE), lambda t: (0, 0)),      # b2_pad (f32, -1e30 pads)
        ],
        out_specs=pl.BlockSpec((kpad, LANE), lambda t: (0, 0)),
        scratch_shapes=[pltpu.VMEM((kpad, H), jnp.float32)],
        compiler_params=pltpu.CompilerParams(
            dimension_semantics=("arbitrary",)),
    )(sid_pad, hidden_pad, cls_pad, invc,
      params["w1_top"], params["w1_bot"], params["b1"],
      params["w2_pad"], params["b2_pad"])


# --------------------------------------------------------------------------
# Multiclass focal loss (tiny, data-dependent sort -> plain JAX glue).
# --------------------------------------------------------------------------
def multiclass_focal_loss(probs, sent_labels_np):
    costs = -jnp.log(probs[jnp.arange(probs.shape[0]), sent_labels_np])
    idx_i = np.where(sent_labels_np > 0)[0]     # entity sentences
    idx_ii = np.where(sent_labels_np == 0)[0]   # 'O' sentences
    n_i = len(idx_i)
    if n_i == 0:
        # Guard: the original divides by int(3.5 * 0) == 0 in this case.
        return jnp.float32(0.0)
    type_i_loss = costs[idx_i]
    type_ii_loss = costs[idx_ii]
    # torch.sort(descending=True)[0][:int(2.5 * N)]
    type_ii_sorted = jnp.sort(type_ii_loss)[::-1]
    type_ii_trunc = type_ii_sorted[: int(2.5 * n_i)]
    total = (type_i_loss.sum() + type_ii_trunc.sum()) / int(3.5 * n_i) * 1.0
    return total


# --------------------------------------------------------------------------
# Host-side glue reproducing build_dict / avg_vector / label extraction
# (the original already runs these via numpy + Python loops on host).
# --------------------------------------------------------------------------
def build_pooling_tables(sent_ids_np, token_labels_np):
    B, S = sent_ids_np.shape
    uniq = np.unique(sent_ids_np)
    uniq = uniq[uniq != -1]
    K = len(uniq)
    cls_rows = np.zeros((K,), np.int32)          # which batch row's [CLS] to take
    sent_labels = np.zeros((K,), np.int32)
    counts = np.zeros((K,), np.float32)
    sid_remap = -np.ones((B, S), np.int32)       # token -> dense sentence index
    flat_sid = sent_ids_np.reshape(-1)
    flat_lab = token_labels_np.reshape(-1)
    flat_remap = sid_remap.reshape(-1)
    for kk, k in enumerate(uniq):
        rows = np.where((sent_ids_np == k).any(axis=1))[0]
        cls_rows[kk] = rows[-1]                  # build_dict: last row containing k wins
        toks = np.where(flat_sid == k)[0]
        counts[kk] = len(toks)
        sent_labels[kk] = flat_lab[toks[0]]      # labels[mask][0]
        flat_remap[toks] = kk                    # avg_vector: mean over these tokens
    return cls_rows, sid_remap, counts, sent_labels


def ner_model_forward(hidden, sent_ids_np, token_labels_np, params,
                      extract_feats=True):
    B, S, _ = hidden.shape
    cls_rows, sid_remap, counts, sent_labels_np = build_pooling_tables(
        sent_ids_np, token_labels_np)
    K = len(cls_rows)
    # Fixed K bucket (multiple of 16 for bf16 sublanes) -> no per-batch retrace.
    KPAD = max(16, int(np.ceil(K / 16)) * 16)
    BS = B * S
    BS_pad = int(np.ceil(BS / TBS)) * TBS

    # Token stream in bf16 + remapped segment ids, padded along the token axis.
    hidden_flat = hidden.reshape(BS, H)
    hidden_pad = jnp.zeros((BS_pad, H), jnp.bfloat16).at[:BS].set(
        hidden_flat.astype(jnp.bfloat16))
    sid_pad_np = -np.ones((1, BS_pad), np.int32)
    sid_pad_np[0, :BS] = sid_remap.reshape(-1)
    sid_pad = jnp.asarray(sid_pad_np)

    # CLS rows gathered wrapper-side (no one-hot matmul) + inverse counts.
    cls_sel = hidden[jnp.asarray(cls_rows), 0, :]
    cls_pad = jnp.zeros((KPAD, H), jnp.bfloat16).at[:K].set(
        cls_sel.astype(jnp.bfloat16))
    invc_np = np.zeros((KPAD, 1), np.float32)
    invc_np[:K, 0] = 1.0 / counts
    invc = jnp.asarray(invc_np)

    probs_pad = ner_head(sid_pad, hidden_pad, cls_pad, invc, params)
    probs = probs_pad[:K, :NCLS]                 # drop K / lane padding
    cost = multiclass_focal_loss(probs, sent_labels_np)
    if not extract_feats:
        return cost
    preds = jnp.argmax(probs, axis=1)
    return cost, jnp.asarray(sent_labels_np), preds, probs


# --------------------------------------------------------------------------
# Pure-JAX reference (same bf16 mixed-precision scheme) for correctness check.
# --------------------------------------------------------------------------
def reference_forward(hidden, sent_ids_np, token_labels_np, params):
    B, S, _ = hidden.shape
    cls_rows, sid_remap, counts, sent_labels_np = build_pooling_tables(
        sent_ids_np, token_labels_np)
    K = len(cls_rows)
    hidden_bf = hidden.reshape(B * S, H).astype(jnp.bfloat16)
    onehot = (sid_remap.reshape(-1)[None, :] ==
              np.arange(K)[:, None]).astype(np.float32)
    seg_sum = jnp.dot(jnp.asarray(onehot).astype(jnp.bfloat16), hidden_bf,
                      preferred_element_type=jnp.float32)
    mean = seg_sum * jnp.asarray((1.0 / counts)[:, None].astype(np.float32))
    cls_bf = hidden[jnp.asarray(cls_rows), 0, :].astype(jnp.bfloat16)
    h = (jnp.dot(cls_bf, params["w1_top"], preferred_element_type=jnp.float32)
         + jnp.dot(mean.astype(jnp.bfloat16), params["w1_bot"],
                   preferred_element_type=jnp.float32)
         + params["b1"])
    h = jnp.maximum(h, 0.0)
    logits = (jnp.dot(h.astype(jnp.bfloat16), params["w2_pad"][:, :NCLS],
                      preferred_element_type=jnp.float32)
              + params["b2_pad"][:, :NCLS])
    probs = jax.nn.softmax(logits, axis=1)
    cost = multiclass_focal_loss(probs, sent_labels_np)
    return cost, probs


if __name__ == "__main__":
    key = jax.random.PRNGKey(0)
    kh, k1, k2, k3, k4 = jax.random.split(key, 5)

    B, S = 2, 128   # small synthetic shapes; hidden stays 768 as the module implies

    # Synthetic stand-in for BertModel(...)[0]  -- (B, S, 768) hidden states.
    hidden = jax.random.normal(kh, (B, S, H), dtype=jnp.float32)

    # Sentence ids per token (-1 = padding), 8 sentences total.
    sent_ids_np = -np.ones((B, S), np.int32)
    for j in range(4):                           # row 0: sentences 0..3, 32 tokens each
        sent_ids_np[0, j * 32:(j + 1) * 32] = j
    pos = 0
    for j, L in enumerate([40, 40, 20, 14]):     # row 1: sentences 4..7, tail is -1 pad
        sent_ids_np[1, pos:pos + L] = 4 + j
        pos += L

    # Token-level entity labels in {0..3}; every token of a sentence carries it.
    sent_label_map = {0: 1, 1: 0, 2: 2, 3: 0, 4: 3, 5: 1, 6: 0, 7: 2}
    token_labels_np = np.zeros((B, S), np.int32)
    for b in range(B):
        for s in range(S):
            k = int(sent_ids_np[b, s])
            if k != -1:
                token_labels_np[b, s] = sent_label_map[k]

    # Deterministic head parameters (PyTorch Linear stored transposed: x @ W + b).
    w1 = jax.random.normal(k1, (2 * H, HID), dtype=jnp.float32) * 0.02
    b1 = jax.random.normal(k2, (1, HID), dtype=jnp.float32) * 0.02
    w2 = jax.random.normal(k3, (HID, NCLS), dtype=jnp.float32) * 0.02
    b2 = jax.random.normal(k4, (1, NCLS), dtype=jnp.float32) * 0.02

    # Split W1 for the concat-free first layer; bf16 weights (f32 accumulation).
    w2_pad = jnp.zeros((HID, LANE), jnp.float32).at[:, :NCLS].set(w2)
    b2_pad = jnp.full((1, LANE), -1e30, jnp.float32).at[:, :NCLS].set(b2)
    params = {
        "w1_top": w1[:H, :].astype(jnp.bfloat16),
        "w1_bot": w1[H:, :].astype(jnp.bfloat16),
        "b1": b1,
        "w2_pad": w2_pad.astype(jnp.bfloat16),
        "b2_pad": b2_pad,
    }

    cost, sent_labels, preds, probs = ner_model_forward(
        hidden, sent_ids_np, token_labels_np, params, extract_feats=True)
    jax.block_until_ready((cost, sent_labels, preds, probs))

    ref_cost, ref_probs = reference_forward(
        hidden, sent_ids_np, token_labels_np, params)
    np.testing.assert_allclose(np.asarray(probs), np.asarray(ref_probs),
                               rtol=1e-3, atol=1e-5)
    np.testing.assert_allclose(float(cost), float(ref_cost),
                               rtol=1e-3, atol=1e-5)

    print("KERNEL_OK")
</pallas_src>

<mosaic_0001>
module attributes {stable_mosaic.version = 11 : i64} {
  func.func @ner_head_kernel(%arg0: i32, %arg1: memref<1x128xi32, #tpu.memory_space<vmem>>, %arg2: memref<128x768xbf16, #tpu.memory_space<vmem>>, %arg3: memref<16x768xbf16, #tpu.memory_space<vmem>>, %arg4: memref<16x1xf32, #tpu.memory_space<vmem>>, %arg5: memref<768x512xbf16, #tpu.memory_space<vmem>>, %arg6: memref<768x512xbf16, #tpu.memory_space<vmem>>, %arg7: memref<1x512xf32, #tpu.memory_space<vmem>>, %arg8: memref<512x128xbf16, #tpu.memory_space<vmem>>, %arg9: memref<1x128xf32, #tpu.memory_space<vmem>>, %arg10: memref<16x128xf32, #tpu.memory_space<vmem>>, %arg11: memref<16x768xf32, #tpu.memory_space<vmem>>) attributes {dimension_semantics = [#tpu.dimension_semantics<arbitrary>], iteration_bounds = array<i64: 2>, scalar_prefetch = 0 : i64, scratch_operands = 1 : i64, tpu.core_type = #tpu.core_type<tc>, window_params = [{transform_indices = @transform_0, window_bounds = array<i64: 1, 128>}, {transform_indices = @transform_1, window_bounds = array<i64: 128, 768>}, {pipeline_mode = #tpu.pipeline_mode<synchronous>, transform_indices = @transform_2, window_bounds = array<i64: 16, 768>}, {pipeline_mode = #tpu.pipeline_mode<synchronous>, transform_indices = @transform_3, window_bounds = array<i64: 16, 1>}, {pipeline_mode = #tpu.pipeline_mode<synchronous>, transform_indices = @transform_4, window_bounds = array<i64: 768, 512>}, {pipeline_mode = #tpu.pipeline_mode<synchronous>, transform_indices = @transform_5, window_bounds = array<i64: 768, 512>}, {pipeline_mode = #tpu.pipeline_mode<synchronous>, transform_indices = @transform_6, window_bounds = array<i64: 1, 512>}, {pipeline_mode = #tpu.pipeline_mode<synchronous>, transform_indices = @transform_7, window_bounds = array<i64: 512, 128>}, {pipeline_mode = #tpu.pipeline_mode<synchronous>, transform_indices = @transform_8, window_bounds = array<i64: 1, 128>}, {pipeline_mode = #tpu.pipeline_mode<synchronous>, transform_indices = @transform_9, window_bounds = array<i64: 16, 128>}]} {
    %c0_i32 = arith.constant 0 : i32
    %0 = arith.cmpi eq, %arg0, %c0_i32 : i32
    %1 = arith.extui %0 : i1 to i32
    %c0_i32_0 = arith.constant 0 : i32
    %2 = arith.cmpi ne, %1, %c0_i32_0 : i32
    scf.if %2 {
      %cst_11 = arith.constant 0.000000e+00 : f32
      %19 = vector.broadcast %cst_11 : f32 to vector<16x768xf32>
      %c0_12 = arith.constant 0 : index
      %c0_13 = arith.constant 0 : index
      %20 = vector.load %arg11[%c0_12, %c0_13] : memref<16x768xf32, #tpu.memory_space<vmem>>, vector<16x768xf32>
      tpu.vector_store %arg11[%c0_12, %c0_13], %19 {strides = array<i32>} : memref<16x768xf32, #tpu.memory_space<vmem>>, vector<16x768xf32>,
    } else {
    }
    %c0 = arith.constant 0 : index
    %c0_1 = arith.constant 0 : index
    %3 = vector.load %arg1[%c0, %c0_1] : memref<1x128xi32, #tpu.memory_space<vmem>>, vector<1x128xi32>
    %4 = tpu.iota {dimensions = array<i32: 0>} : vector<16x128xi32>
    %5 = vector.broadcast %3 : vector<1x128xi32> to vector<16x128xi32>
    %6 = arith.cmpi eq, %5, %4 : vector<16x128xi32>
    %cst = arith.constant 1.000000e+00 : f32
    %cst_2 = arith.constant 0.000000e+00 : f32
    %7 = vector.broadcast %cst : f32 to vector<16x128xf32>
    %8 = vector.broadcast %cst_2 : f32 to vector<16x128xf32>
    %9 = arith.select %6, %7, %8 : vector<16x128xi1>, vector<16x128xf32>
    %10 = arith.truncf %9 : vector<16x128xf32> to vector<16x128xbf16>
    %c0_3 = arith.constant 0 : index
    %c0_4 = arith.constant 0 : index
    %11 = vector.load %arg11[%c0_3, %c0_4] : memref<16x768xf32, #tpu.memory_space<vmem>>, vector<16x768xf32>
    %c0_5 = arith.constant 0 : index
    %c0_6 = arith.constant 0 : index
    %12 = vector.load %arg2[%c0_5, %c0_6] : memref<128x768xbf16, #tpu.memory_space<vmem>>, vector<128x768xbf16>
    %cst_7 = arith.constant dense<0.000000e+00> : vector<16x768xf32>
    %13 = tpu.matmul %10, %12, %cst_7 {dimension_numbers = #tpu.dot_dimension_numbers<[1], [0], [0], [1], [0, 0, 1, 1], [], []>} : vector<16x128xbf16>, vector<128x768xbf16>, vector<16x768xf32> -> vector<16x768xf32>
    %14 = arith.addf %11, %13 : vector<16x768xf32>
    %c0_8 = arith.constant 0 : index
    %c0_9 = arith.constant 0 : index
    %15 = vector.load %arg11[%c0_8, %c0_9] : memref<16x768xf32, #tpu.memory_space<vmem>>, vector<16x768xf32>
    tpu.vector_store %arg11[%c0_8, %c0_9], %14 {strides = array<i32>} : memref<16x768xf32, #tpu.memory_space<vmem>>, vector<16x768xf32>,
    %c1_i32 = arith.constant 1 : i32
    %16 = arith.cmpi eq, %arg0, %c1_i32 : i32
    %17 = arith.extui %16 : i1 to i32
    %c0_i32_10 = arith.constant 0 : i32
    %18 = arith.cmpi ne, %17, %c0_i32_10 : i32
    scf.if %18 {
      %c0_11 = arith.constant 0 : index
      %c0_12 = arith.constant 0 : index
      %19 = vector.load %arg11[%c0_11, %c0_12] : memref<16x768xf32, #tpu.memory_space<vmem>>, vector<16x768xf32>
      %c0_13 = arith.constant 0 : index
      %c0_14 = arith.constant 0 : index
      %20 = vector.load %arg4[%c0_13, %c0_14] : memref<16x1xf32, #tpu.memory_space<vmem>>, vector<16x1xf32>
      %21 = vector.broadcast %20 : vector<16x1xf32> to vector<16x768xf32>
      %22 = arith.mulf %19, %21 : vector<16x768xf32>
      %c0_15 = arith.constant 0 : index
      %c0_16 = arith.constant 0 : index
      %23 = vector.load %arg3[%c0_15, %c0_16] : memref<16x768xbf16, #tpu.memory_space<vmem>>, vector<16x768xbf16>
      %c0_17 = arith.constant 0 : index
      %c0_18 = arith.constant 0 : index
      %24 = vector.load %arg5[%c0_17, %c0_18] : memref<768x512xbf16, #tpu.memory_space<vmem>>, vector<768x512xbf16>
      %cst_19 = arith.constant dense<0.000000e+00> : vector<16x512xf32>
      %25 = tpu.matmul %23, %24, %cst_19 {dimension_numbers = #tpu.dot_dimension_numbers<[1], [0], [0], [1], [0, 0, 1, 1], [], []>} : vector<16x768xbf16>, vector<768x512xbf16>, vector<16x512xf32> -> vector<16x512xf32>
      %26 = arith.truncf %22 : vector<16x768xf32> to vector<16x768xbf16>
      %c0_20 = arith.constant 0 : index
      %c0_21 = arith.constant 0 : index
      %27 = vector.load %arg6[%c0_20, %c0_21] : memref<768x512xbf16, #tpu.memory_space<vmem>>, vector<768x512xbf16>
      %cst_22 = arith.constant dense<0.000000e+00> : vector<16x512xf32>
      %28 = tpu.matmul %26, %27, %cst_22 {dimension_numbers = #tpu.dot_dimension_numbers<[1], [0], [0], [1], [0, 0, 1, 1], [], []>} : vector<16x768xbf16>, vector<768x512xbf16>, vector<16x512xf32> -> vector<16x512xf32>
      %29 = arith.addf %25, %28 : vector<16x512xf32>
      %c0_23 = arith.constant 0 : index
      %c0_24 = arith.constant 0 : index
      %30 = vector.load %arg7[%c0_23, %c0_24] : memref<1x512xf32, #tpu.memory_space<vmem>>, vector<1x512xf32>
      %31 = vector.broadcast %30 : vector<1x512xf32> to vector<16x512xf32>
      %32 = arith.addf %29, %31 : vector<16x512xf32>
      %cst_25 = arith.constant 0.000000e+00 : f32
      %33 = vector.broadcast %cst_25 : f32 to vector<16x512xf32>
      %34 = arith.maximumf %32, %33 : vector<16x512xf32>
      %35 = arith.truncf %34 : vector<16x512xf32> to vector<16x512xbf16>
      %c0_26 = arith.constant 0 : index
      %c0_27 = arith.constant 0 : index
      %36 = vector.load %arg8[%c0_26, %c0_27] : memref<512x128xbf16, #tpu.memory_space<vmem>>, vector<512x128xbf16>
      %cst_28 = arith.constant dense<0.000000e+00> : vector<16x128xf32>
      %37 = tpu.matmul %35, %36, %cst_28 {dimension_numbers = #tpu.dot_dimension_numbers<[1], [0], [0], [1], [0, 0, 1, 1], [], []>} : vector<16x512xbf16>, vector<512x128xbf16>, vector<16x128xf32> -> vector<16x128xf32>
      %c0_29 = arith.constant 0 : index
      %c0_30 = arith.constant 0 : index
      %38 = vector.load %arg9[%c0_29, %c0_30] : memref<1x128xf32, #tpu.memory_space<vmem>>, vector<1x128xf32>
      %39 = vector.broadcast %38 : vector<1x128xf32> to vector<16x128xf32>
      %40 = arith.addf %37, %39 : vector<16x128xf32>
      %cst_31 = arith.constant dense<0xFF800000> : vector<16xf32>
      %41 = vector.multi_reduction <maximumf>, %40, %cst_31 [1] : vector<16x128xf32> to vector<16xf32>
      %42 = vector.shape_cast %41 : vector<16xf32> to vector<16x1xf32>
      %43 = vector.broadcast %42 : vector<16x1xf32> to vector<16x128xf32>
      %44 = arith.subf %40, %43 : vector<16x128xf32>
      %45 = math.exp %44 : vector<16x128xf32>
      %cst_32 = arith.constant dense<0.000000e+00> : vector<16xf32>
      %46 = vector.multi_reduction <add>, %45, %cst_32 [1] : vector<16x128xf32> to vector<16xf32>
      %47 = vector.shape_cast %46 : vector<16xf32> to vector<16x1xf32>
      %48 = vector.broadcast %47 : vector<16x1xf32> to vector<16x128xf32>
      %49 = arith.divf %45, %48 : vector<16x128xf32>
      %c0_33 = arith.constant 0 : index
      %c0_34 = arith.constant 0 : index
      %50 = vector.load %arg10[%c0_33, %c0_34] : memref<16x128xf32, #tpu.memory_space<vmem>>, vector<16x128xf32>
      tpu.vector_store %arg10[%c0_33, %c0_34], %49 {strides = array<i32>} : memref<16x128xf32, #tpu.memory_space<vmem>>, vector<16x128xf32>,
    } else {
    }
    return
  }
  func.func @transform_0(%arg0: i32) -> (i32, i32) {
    %c0_i32 = arith.constant 0 : i32
    %c0_i32_0 = arith.constant 0 : i32
    return %c0_i32, %arg0 : i32, i32
  }
  func.func @transform_1(%arg0: i32) -> (i32, i32) {
    %c0_i32 = arith.constant 0 : i32
    %c0_i32_0 = arith.constant 0 : i32
    return %arg0, %c0_i32 : i32, i32
  }
  func.func @transform_2(%arg0: i32) -> (i32, i32) {
    %c0_i32 = arith.constant 0 : i32
    %c0_i32_0 = arith.constant 0 : i32
    %c0_i32_1 = arith.constant 0 : i32
    return %c0_i32, %c0_i32_0 : i32, i32
  }
  func.func @transform_3(%arg0: i32) -> (i32, i32) {
    %c0_i32 = arith.constant 0 : i32
    %c0_i32_0 = arith.constant 0 : i32
    %c0_i32_1 = arith.constant 0 : i32
    return %c0_i32, %c0_i32_0 : i32, i32
  }
  func.func @transform_4(%arg0: i32) -> (i32, i32) {
    %c0_i32 = arith.constant 0 : i32
    %c0_i32_0 = arith.constant 0 : i32
    %c0_i32_1 = arith.constant 0 : i32
    return %c0_i32, %c0_i32_0 : i32, i32
  }
  func.func @transform_5(%arg0: i32) -> (i32, i32) {
    %c0_i32 = arith.constant 0 : i32
    %c0_i32_0 = arith.constant 0 : i32
    %c0_i32_1 = arith.constant 0 : i32
    return %c0_i32, %c0_i32_0 : i32, i32
  }
  func.func @transform_6(%arg0: i32) -> (i32, i32) {
    %c0_i32 = arith.constant 0 : i32
    %c0_i32_0 = arith.constant 0 : i32
    %c0_i32_1 = arith.constant 0 : i32
    return %c0_i32, %c0_i32_0 : i32, i32
  }
  func.func @transform_7(%arg0: i32) -> (i32, i32) {
    %c0_i32 = arith.constant 0 : i32
    %c0_i32_0 = arith.constant 0 : i32
    %c0_i32_1 = arith.constant 0 : i32
    return %c0_i32, %c0_i32_0 : i32, i32
  }
  func.func @transform_8(%arg0: i32) -> (i32, i32) {
    %c0_i32 = arith.constant 0 : i32
    %c0_i32_0 = arith.constant 0 : i32
    %c0_i32_1 = arith.constant 0 : i32
    return %c0_i32, %c0_i32_0 : i32, i32
  }
  func.func @transform_9(%arg0: i32) -> (i32, i32) {
    %c0_i32 = arith.constant 0 : i32
    %c0_i32_0 = arith.constant 0 : i32
    %c0_i32_1 = arith.constant 0 : i32
    return %c0_i32, %c0_i32_0 : i32, i32
  }
}

</mosaic_0001>

<bundles_post_ra>
// kernel: tpu_custom_call.1
= control target key start
LH: loop header
LB: loop body
LE: loop exit
PB: predicated region body
PF: predicated region fallthrough
CT: control target
= control target key end

     0   :  { %s6326_s0 = inlined_call_operand.vmem [shape: s32[1,256], index: 0, kind: input, shape index: {}]   ;;  %s6327_s1 = inlined_call_operand.hbm [shape: bf16[256,768], index: 1, kind: input, shape index: {}]   ;;  %s6328_s2 = inlined_call_operand.hbm [shape: bf16[16,768], index: 2, kind: input, shape index: {}]   ;;  %s6329_s3 = inlined_call_operand.vmem [shape: f32[16,1], index: 3, kind: input, shape index: {}]   ;;  %s6330_s4 = inlined_call_operand.hbm [shape: bf16[768,512], index: 4, kind: input, shape index: {}]   ;;  %s6331_s5 = inlined_call_operand.hbm [shape: bf16[768,512], index: 5, kind: input, shape index: {}]   ;;  %s6332_s6 = inlined_call_operand.vmem [shape: f32[1,512], index: 6, kind: input, shape index: {}]   ;;  %s6333_s7 = inlined_call_operand.hbm [shape: bf16[512,128], index: 7, kind: input, shape index: {}]   ;;  %s6334_s8 = inlined_call_operand.vmem [shape: f32[1,128], index: 8, kind: input, shape index: {}]   ;;  %s6335_s9 = inlined_call_operand.hbm [shape: f32[16,128], index: 9, kind: output, shape index: {}]  }
   0x1   :  { %6341 = sst [smem:[#allocation17_spill]] %s6334_s8 }
   0x2   :  { %6342 = sst [smem:[#allocation18_spill]] %s6335_s9 }
   0x3   :  { %14 = vsyncpa [#allocation4], 0 }
   0x4   :  { %16 = vsyncpa [#allocation4 + $0x1], 0 }
   0x5   :  { %17 = vsyncpa [#allocation7], 0 }
   0x6   :  { %18 = vsyncpa [#allocation10], 0 }
   0x7   :  { %19 = vsyncpa [#allocation5], 0  ;;  %s5978_s30 = smov 0   ;;  %s5980_s10 = smov 0  }
   0x8   :  { %s5982_s11 = smov 0   ;;  %s5984_s12 = smov 0  }
   0x9 LB: > { %s5997_s13 = sadd.s32 4294967295, %s5908_s12   ;;  %p71_p0 = scmp.ne.s32.totalorder %s5900_s10, %s5896_s30  ;;  %s5908_s12 = sphi %s5984_s12, %s6363_s12   ;;  %s5904_s11 = sphi %s5982_s11, %s6362_s11   ;;  %s5900_s10 = sphi %s5980_s10, %s6361_s10   ;;  %s5896_s30 = sphi %s5978_s30, %s6360_s30  }
   0xa   : > { %p6336_p1 = scmp.eq.s32.totalorder %s5997_s13, 0  ;;  %p4312_p2 = scmp.ge.s32.totalorder %s5908_s12, 1 }
   0xb   : > { %p250_p3 = scmp.lt.s32.totalorder %s5908_s12, 3  ;;  %s5910_s16 = smov [#allocation6]  }
   0xc   : > { %p6006_p5 = por %p6336_p1, %p71_p0  ;;  %s262_s17 = sshll.u32 %s5910_s16, 4  ;;  %s263_s17 = int_to_ptr.vmem [resolvable:$true] %s262_s17 }
   0xd   : > { %p6010_p6 = pnand %p4312_p2, %p250_p3  ;;  %s5911_s19 = smov [#allocation9]  }
   0xe   : > { %s6343_s14 = scalar_select %p6006_p5, 1, 0 }
   0xf   : > { %s6344_s15 = scalar_select %p6010_p6, 1, 0 }
  0x10   : > { %p4919_p7 = pneg %p6010_p6  ;;  %s291_s20 = sshll.u32 %s5911_s19, 4  ;;  %s292_s20 = int_to_ptr.vmem [resolvable:$true] %s291_s20 }
  0x11   : > { %s5694_s23 = scalar_lea.hbm %s6328_s2, 768 }
  0x12   : > { %p6018_p8 = pnand %p4919_p7, %p6336_p1  ;;  %p5695_p9 = scmp.ne.s32.totalorder %s6328_s2, %s5694_s23 }
  0x13   : > { %p5701_p13 = scmp.lt.u32.totalorder %s5694_s23, %s6328_s2 }
  0x14   : > { %p6030_p10 = pneg %p6018_p8 }
  0x16   : > { %p5697_p11 = pnand %p6030_p10, %p5695_p9 }
  0x18   : > { %p5698_p12 = pneg %p5697_p11 }
  0x1a   : > { %p5703_p0 = pnand %p5701_p13, %p5698_p12 }
  0x1c   : > { %5706 = shalt.err (!%p5703_p0)
}
  0x1d   : > { %s5707_s29 = scalar_lea.vmem %s263_s17, 768  ;;  %p5715_p4 = scmp.lt.s32.totalorder %s263_s17, %s263_s17 }
  0x1e   : > { %p5708_p2 = scmp.ne.s32.totalorder %s263_s17, %s5707_s29  ;;  %p5716_p1 = scmp.lt.s32.totalorder %s5707_s29, %s5707_s29 }
  0x20   : > { %p5710_p3 = pnand %p5708_p2, %p6030_p10  ;;  %p5717_p5 = por %p5716_p1, %p5715_p4 }
  0x22   : > { %p5711_p7 = pneg %p5710_p3 }
  0x24   : > { %p5718_p6 = pnand %p5717_p5, %p5711_p7 }
  0x26   : > { %5721 = shalt.err (!%p5718_p6)
}
  0x27   : > { %s6340_s30 = smov 384   ;;  %s5913_s16 = smov 24  }
  0x28   : > { %4922 = dma.hbm_to_vmem [thread:$0]  (!%p6018_p8), %s6328_s2, 768, %s263_s17, [#allocation7], %s6340_s30, %s6340_s30, %s5913_s16  }
  0x29   : > { %s5914_s22 = smov [#allocation8]   ;;  %s5722_s27 = scalar_lea.hbm %s6331_s5, 24576 }
  0x2a   : > { %s278_s23 = sshll.u32 %s5914_s22, 4  ;;  %p5723_p1 = scmp.ne.s32.totalorder %s6331_s5, %s5722_s27  ;;  %s279_s23 = int_to_ptr.vmem [resolvable:$true] %s278_s23 }
  0x2b   : > { %p5729_p6 = scmp.lt.u32.totalorder %s5722_s27, %s6331_s5 }
  0x2c   : > { %p5725_p4 = pnand %p5723_p1, %p6030_p10 }
  0x2e   : > { %p5726_p5 = pneg %p5725_p4 }
  0x30   : > { %p5731_p9 = pnand %p5729_p6, %p5726_p5 }
  0x32   : > { %5734 = shalt.err (!%p5731_p9)
}
  0x33   : > { %s5735_s17 = scalar_lea.vmem %s292_s20, 24576  ;;  %p5743_p0 = scmp.lt.s32.totalorder %s292_s20, %s292_s20 }
  0x34   : > { %p5736_p11 = scmp.ne.s32.totalorder %s292_s20, %s5735_s17  ;;  %p5744_p2 = scmp.lt.s32.totalorder %s5735_s17, %s5735_s17 }
  0x36   : > { %p5738_p12 = pnand %p5736_p11, %p6030_p10  ;;  %p5745_p3 = por %p5744_p2, %p5743_p0 }
  0x38   : > { %p5739_p13 = pneg %p5738_p12 }
  0x3a   : > { %p5746_p7 = pnand %p5745_p3, %p5739_p13 }
  0x3c   : > { %5749 = shalt.err (!%p5746_p7)
}
  0x3d   : > { %s5915_s19 = smov 256   ;;  %s5916_s21 = smov 16  }
  0x3e   : > { %4928 = dma.hbm_to_vmem [thread:$0]  (!%p6018_p8), %s6331_s5, 24576, %s292_s20, [#allocation10], %s5915_s19, %s5915_s19, %s5916_s21  }
  0x3f   : > { %s5750_s25 = scalar_lea.hbm %s6330_s4, 24576 }
  0x40   : > { %p5751_p1 = scmp.ne.s32.totalorder %s6330_s4, %s5750_s25  ;;  %p5757_p6 = scmp.lt.u32.totalorder %s5750_s25, %s6330_s4 }
  0x42   : > { %p5753_p4 = pnand %p5751_p1, %p6030_p10 }
  0x44   : > { %p5754_p5 = pneg %p5753_p4 }
  0x46   : > { %p5759_p9 = pnand %p5757_p6, %p5754_p5 }
  0x48   : > { %5762 = shalt.err (!%p5759_p9)
}
  0x49   : > { %s5763_s8 = scalar_lea.vmem %s279_s23, 24576  ;;  %p5771_p0 = scmp.lt.s32.totalorder %s279_s23, %s279_s23 }
  0x4a   : > { %p5764_p11 = scmp.ne.s32.totalorder %s279_s23, %s5763_s8  ;;  %p5772_p2 = scmp.lt.s32.totalorder %s5763_s8, %s5763_s8 }
  0x4c   : > { %p5766_p12 = pnand %p5764_p11, %p6030_p10  ;;  %p5773_p3 = por %p5772_p2, %p5771_p0 }
  0x4e   : > { %p5767_p13 = pneg %p5766_p12 }
  0x50   : > { %p5774_p7 = pnand %p5773_p3, %p5767_p13 }
  0x52   : > { %5777 = shalt.err (!%p5774_p7)
}
  0x53   : > { %4925 = dma.hbm_to_vmem [thread:$0]  (!%p6018_p8), %s6330_s4, 24576, %s279_s23, [#allocation7], %s5915_s19, %s5915_s19, %s5916_s21  }
  0x54   : > { %s5917_s22 = smov [#allocation11]   ;;  %s5778_s28 = scalar_lea.hbm %s6333_s7, 4096 }
  0x55   : > { %s307_s24 = sshll.u32 %s5917_s22, 4  ;;  %p5779_p1 = scmp.ne.s32.totalorder %s6333_s7, %s5778_s28  ;;  %s308_s24 = int_to_ptr.vmem [resolvable:$true] %s307_s24 }
  0x56   : > { %p5785_p6 = scmp.lt.u32.totalorder %s5778_s28, %s6333_s7 }
  0x57   : > { %p5781_p4 = pnand %p5779_p1, %p6030_p10 }
  0x59   : > { %p5782_p5 = pneg %p5781_p4 }
  0x5b   : > { %p5787_p9 = pnand %p5785_p6, %p5782_p5 }
  0x5d   : > { %5790 = shalt.err (!%p5787_p9)
}
  0x5e   : > { %s5791_s23 = scalar_lea.vmem %s308_s24, 4096  ;;  %p5799_p0 = scmp.lt.s32.totalorder %s308_s24, %s308_s24 }
  0x5f   : > { %p5792_p11 = scmp.ne.s32.totalorder %s308_s24, %s5791_s23  ;;  %p5800_p2 = scmp.lt.s32.totalorder %s5791_s23, %s5791_s23 }
  0x61   : > { %p5794_p12 = pnand %p5792_p11, %p6030_p10  ;;  %p5801_p3 = por %p5800_p2, %p5799_p0 }
  0x63   : > { %p5795_p13 = pneg %p5794_p12 }
  0x65   : > { %p5802_p7 = pnand %p5801_p3, %p5795_p13 }
  0x67   : > { %5805 = shalt.err (!%p5802_p7)
}
  0x68   : > { %s5918_s19 = smov 64   ;;  %s5919_s26 = smov 4  }
  0x69   : > { %4931 = dma.hbm_to_vmem [thread:$0]  (!%p6018_p8), %s6333_s7, 4096, %s308_s24, [#allocation10], %s5918_s19, %s5918_s19, %s5919_s26  }
  0x6a   : > { %s6104_s20 = sadd.s32 1, %s5908_s12   ;;  %s58_s22 = sadd.s32 1, %s5904_s11 }
  0x6b   : > { %s55_s9 = ssub.s32 %s5908_s12, %s6104_s20  ;;  %p65_p1 = scmp.ne.s32.totalorder %s5904_s11, %s5900_s10 }
  0x6c   : > { %p56_p10 = scmp.eq.s32.totalorder %s55_s9, 0  ;;  %p66_p4 = scmp.eq.s32.totalorder %s5908_s12, 0 }
  0x6d   : > { %p4940_p6 = scmp.lt.s32.totalorder %s5908_s12, 2  ;;  %s330_s27 = sand.u32 1, %s5904_s11  }
  0x6e   : > { %s6113_s25 = scalar_select %p56_p10, %s5904_s11, %s58_s22  }
  0x6f   : > { %p67_p5 = por %p66_p4, %p65_p1  ;;  %s4895_s28 = smul.u32 6144, %s5908_s12 }
  0x70   : > { %s4894_s29 = smul.u32 384, %s330_s27  ;;  %s6129_s12 = scalar_lea.sflag [#allocation4], %s330_s27 }
  0x71   : > { %p6118_p9 = pnand %p4940_p6, %p67_p5  ;;  %s6125_s8 = scalar_lea.hbm %s6327_s1, %s4895_s28 }
  0x72   : > { %s334_s23 = scalar_lea.vmem [#allocation3], %s4894_s29  ;;  %s5806_s26 = scalar_lea.hbm %s6125_s8, 6144 }
  0x73   : > { %s342_s19 = sshll.u32 %s334_s23, 4  ;;  %p5807_p8 = scmp.ne.s32.totalorder %s6125_s8, %s5806_s26  ;;  %s6127_s19 = int_to_ptr.vmem [resolvable:$true] %s342_s19 }
  0x74   : > { %p5808_p11 = pneg %p6118_p9  ;;  %s5811_s9 = scalar_lea.hbm %s6327_s1, 12288 }
  0x75   : > { %p5812_p0 = scmp.lt.u32.totalorder %s6125_s8, %s6327_s1  ;;  %p5813_p2 = scmp.lt.u32.totalorder %s5811_s9, %s5806_s26 }
  0x76   : > { %p5809_p12 = pnand %p5808_p11, %p5807_p8  ;;  %p5815_p7 = scmp.lt.u32.totalorder %s5806_s26, %s6125_s8 }
  0x77   : > { %p5814_p3 = por %p5813_p2, %p5812_p0 }
  0x78   : > { %p5810_p13 = pneg %p5809_p12 }
  0x79   : > { %p5816_p10 = por %p5815_p7, %p5814_p3 }
  0x7b   : > { %p5817_p1 = pnand %p5816_p10, %p5810_p13 }
  0x7d   : > { %5820 = shalt.err (!%p5817_p1)
}
  0x7e   : > { %s5821_s27 = scalar_lea.vmem %s6127_s19, 6144  ;;  %s5920_s29 = smov [#allocation3]  }
  0x7f   : > { %p5822_p4 = scmp.ne.s32.totalorder %s6127_s19, %s5821_s27  ;;  %s5826_s24 = sshll.u32 %s5920_s29, 4  ;;  %s5827_s24 = int_to_ptr.vmem [resolvable:$false] %s5826_s24 }
  0x80   : > { %s5828_s17 = scalar_lea.vmem %s5827_s24, 12288  ;;  %p5829_p8 = scmp.lt.s32.totalorder %s6127_s19, %s5827_s24 }
  0x81   : > { %p5824_p5 = pnand %p5822_p4, %p5808_p11  ;;  %p5830_p12 = scmp.lt.s32.totalorder %s5828_s17, %s5821_s27 }
  0x83   : > { %p5825_p6 = pneg %p5824_p5  ;;  %p5831_p0 = por %p5830_p12, %p5829_p8 }
  0x85   : > { %p5832_p2 = pnand %p5831_p0, %p5825_p6 }
  0x87   : > { %5835 = shalt.err (!%p5832_p2)
}
  0x88   : > { %s6348_s23 = smov 384   ;;  %p6349_p11 = scmp.ne.s32.totalorder %s6344_s15, 0 }
  0x89   : > { %4935 = dma.hbm_to_vmem [thread:$0]  (!%p6118_p9), %s6125_s8, 6144, %s6127_s19, %s6129_s12, %s6348_s23, %s6348_s23, %s5913_s16  }
  0x8a   : > { %354 = sbr.rel (%p6349_p11) target bundleno = 1567 (0x61f), region = 56  ;;  %s356_s26 = sand.u32 (!%p6349_p11), 1, %s5900_s10  }
  0x8b   : > { %s4896_s30 = smul.u32 (!%p6349_p11), 384, %s356_s26  ;;  %s357_s21 = scalar_lea.sflag (!%p6349_p11), [#allocation4], %s356_s26 }
  0x8c   : > { %p6350_p13 = scmp.ne.s32.totalorder (!%p6349_p11), %s6343_s14, 0 }
  0x8d   : > { %s6163_s9 = scalar_lea.vmem (!%p6349_p11), [#allocation3], %s4896_s30 }
  0x91   : > { %5879 = dma.done.wait (%p6350_p13), %s357_s21, 6144  }
  0x92   : > { %5881 = vsyncadd (%p6350_p13), %s357_s21, 4294961152  ;;  %p6351_p3 = scmp.eq.s32.totalorder %s5997_s13, 0 }
  0x94   : > { %5883 = dma.done.wait (%p6351_p3), [#allocation7], 25344   ;;  %p6352_p9 = pmov %p6351_p3 }
  0x95   : > { %p6353_p7 = pmov %p6351_p3 }
  0x96   : > { %5885 = vsyncadd (%p6352_p9), [#allocation7], 4294941952 }
  0x97   : > { %5887 = dma.done.wait (%p6353_p7), [#allocation10], 28672   ;;  %p6354_p10 = pmov %p6351_p3 }
  0x98   : > { %p409_p1 = scmp.lt.s32.totalorder %s5997_s13, 1  ;;  %p6355_p4 = scmp.ne.s32.totalorder %s5997_s13, 0 }
  0x99   : > { %5889 = vsyncadd (%p6354_p10), [#allocation10], 4294938624  ;;  %v5921_v0 = vmov (!%p6355_p4), 0.0  }
  0x9a   : > { %s6179_s15 = scalar_select %p409_p1, %s5997_s13, 1 }
  0x9b   : > { %417 = sbr.rel (%p6355_p4) target bundleno = 162 (0xa2), region = 80  ;;  %418 = vst [vmem:[#allocation2] sm:$0xff] (!%p6355_p4), %v5921_v0  ;;  %419 = vst [vmem:[#allocation2 + $0x8] sm:$0xff] (!%p6355_p4), %v5921_v0 }
  0x9c   : > { %s411_s18 = scalar_lea.vmem %s6326_s0, %s6179_s15  ;;  %420 = vst [vmem:[#allocation2 + $0x10] sm:$0xff] (!%p6355_p4), %v5921_v0  ;;  %421 = vst [vmem:[#allocation2 + $0x18] sm:$0xff] (!%p6355_p4), %v5921_v0 }
  0x9d   : > { %422 = vst [vmem:[#allocation2 + $0x20] sm:$0xff] (!%p6355_p4), %v5921_v0  ;;  %423 = vst [vmem:[#allocation2 + $0x28] sm:$0xff] (!%p6355_p4), %v5921_v0 }
  0x9e   : > { %424 = vst [vmem:[#allocation2 + $0x30] sm:$0xff] (!%p6355_p4), %v5921_v0  ;;  %425 = vst [vmem:[#allocation2 + $0x38] sm:$0xff] (!%p6355_p4), %v5921_v0 }
  0x9f   : > { %426 = vst [vmem:[#allocation2 + $0x40] sm:$0xff] (!%p6355_p4), %v5921_v0  ;;  %427 = vst [vmem:[#allocation2 + $0x48] sm:$0xff] (!%p6355_p4), %v5921_v0 }
  0xa0   : > { %428 = vst [vmem:[#allocation2 + $0x50] sm:$0xff] (!%p6355_p4), %v5921_v0  ;;  %429 = vst [vmem:[#allocation2 + $0x58] sm:$0xff] (!%p6355_p4), %v5921_v0 }
  0xa2 PF: > { %v4996_v1 = vld [vmem:[%s6163_s9 + $0x4] ss:$24 sps:$4 sm:$0xff]   ;;  %v4998_v2 = vld [vmem:[%s6163_s9] ss:$24 sps:$4 sm:$0xff]   ;;  %v5922_v3 = vmov 0   ;;  %v431_v14 = vlaneseq  ;;  %v444_v57 = vld [vmem:[#allocation2 + $0x8] sm:$0xff] }
  0xa3   : > { %775 = vmatprep.mubr.bf16.mxu0 %v5922_v3  ;;  %818 = vmatprep.mubr.bf16.mxu1 %v5922_v3  ;;  %v4999_v4 = vld [vmem:[%s6163_s9 + $0x34] ss:$24 sps:$4 sm:$0xff]   ;;  %v5001_v5 = vld [vmem:[%s6163_s9 + $0x30] ss:$24 sps:$4 sm:$0xff]   ;;  %v5002_v6 = vld [vmem:[%s6163_s9 + $0x64] ss:$24 sps:$4 sm:$0xff]  }
  0xa4   : > { %743 = vmatprep.subr.bf16.mxu0 %v4996_v1  ;;  %v5004_v7 = vld [vmem:[%s6163_s9 + $0x60] ss:$24 sps:$4 sm:$0xff]   ;;  %v5005_v8 = vld [vmem:[%s6163_s9 + $0x94] ss:$24 sps:$4 sm:$0xff]   ;;  %v5007_v9 = vld [vmem:[%s6163_s9 + $0x90] ss:$24 sps:$4 sm:$0xff]  }
  0xa5   : > { %744 = vmatpush1.bf16.msra.mxu0 %v4998_v2  ;;  %v5020_v10 = vld [vmem:[%s6163_s9 + $0xc] ss:$24 sps:$4 sm:$0xff]   ;;  %v5022_v11 = vld [vmem:[%s6163_s9 + $0x8] ss:$24 sps:$4 sm:$0xff]   ;;  %v5026_v15 = vld [vmem:[%s6163_s9 + $0x3c] ss:$24 sps:$4 sm:$0xff]  }
  0xa6   : > { %745 = vmatprep.subr.bf16.mxu0 %v4999_v4  ;;  %v5008_v12 = vld [vmem:[%s6163_s9 + $0xc4] ss:$24 sps:$4 sm:$0xff]   ;;  %786 = vmatprep.subr.bf16.mxu1 %v5020_v10  ;;  %v5010_v13 = vld [vmem:[%s6163_s9 + $0xc0] ss:$24 sps:$4 sm:$0xff]   ;;  %v5011_v17 = vld [vmem:[%s6163_s9 + $0xf4] ss:$24 sps:$4 sm:$0xff]  }
  0xa7   : > { %787 = vmatpush1.bf16.msra.mxu1 %v5022_v11  ;;  %v5028_v16 = vld [vmem:[%s6163_s9 + $0x38] ss:$24 sps:$4 sm:$0xff]   ;;  %v5032_v18 = vld [vmem:[%s6163_s9 + $0x6c] ss:$24 sps:$4 sm:$0xff]   ;;  %v6205_v19 = vshrl.u32 %v431_v14, 7  ;;  %p4382_p5 = scmp.ne.s32.totalorder %s5997_s13, 1 }
  0xa8   : > { %788 = vmatprep.subr.bf16.mxu1 %v5026_v15  ;;  %v5034_v20 = vld [vmem:[%s6163_s9 + $0x68] ss:$24 sps:$4 sm:$0xff]   ;;  %v5014_v22 = vld [vmem:[%s6163_s9 + $0x124] ss:$24 sps:$4 sm:$0xff]   ;;  %v5040_v27 = vld [vmem:[%s6163_s9 + $0x98] ss:$24 sps:$4 sm:$0xff]  }
  0xa9   : > { %746 = vmatpush1.bf16.msra.mxu0 %v5001_v5  ;;  %v5013_v21 = vld [vmem:[%s6163_s9 + $0xf0] ss:$24 sps:$4 sm:$0xff]   ;;  %v5038_v23 = vld [vmem:[%s6163_s9 + $0x9c] ss:$24 sps:$4 sm:$0xff]   ;;  %v5016_v24 = vld [vmem:[%s6163_s9 + $0x120] ss:$24 sps:$4 sm:$0xff]  }
  0xaa   : > { %747 = vmatprep.subr.bf16.mxu0 %v5002_v6  ;;  %v4327_v25 = vld [vmem:[%s411_s18] ss:$0 sm:$0xff]  ;;  %v433_v26 = vadd.s32 8, %v6205_v19  ;;  %v5044_v28 = vld [vmem:[%s6163_s9 + $0xcc] ss:$24 sps:$4 sm:$0xff]   ;;  %v449_v59 = vld [vmem:[#allocation2 + $0x30] sm:$0xff] }
  0xab   : > { %789 = vmatpush1.bf16.msra.mxu1 %v5028_v16  ;;  %v5017_v29 = vld [vmem:[%s6163_s9 + $0x154] ss:$24 sps:$4 sm:$0xff]   ;;  %v5019_v30 = vld [vmem:[%s6163_s9 + $0x150] ss:$24 sps:$4 sm:$0xff]   ;;  %vm438_vm0 = vcmp.eq.s32.totalorder %v4327_v25, %v6205_v19  ;;  %v5031_v38 = vld [vmem:[%s6163_s9 + $0x44] ss:$24 sps:$4 sm:$0xff]  }
  0xac   : > { %790 = vmatprep.subr.bf16.mxu1 %v5032_v18  ;;  %vm439_vm1 = vcmp.eq.s32.totalorder %v4327_v25, %v433_v26  ;;  %v5046_v31 = vld [vmem:[%s6163_s9 + $0xc8] ss:$24 sps:$4 sm:$0xff]   ;;  %v5050_v32 = vld [vmem:[%s6163_s9 + $0xfc] ss:$24 sps:$4 sm:$0xff]   ;;  %v5052_v36 = vld [vmem:[%s6163_s9 + $0xf8] ss:$24 sps:$4 sm:$0xff]  }
  0xad   : > { %748 = vmatpush1.bf16.msra.mxu0 %v5004_v7  ;;  %v5025_v33 = vld [vmem:[%s6163_s9 + $0x14] ss:$24 sps:$4 sm:$0xff]   ;;  %vm6226_vm2 = vmpackc.low %vm439_vm1, %vm438_vm0  ;;  %v5023_v35 = vld [vmem:[%s6163_s9 + $0x10] ss:$24 sps:$4 sm:$0xff]   ;;  %v5923_v39 = vmov 1.0|1.0  }
  0xae   : > { %749 = vmatprep.subr.bf16.mxu0 %v5005_v8  ;;  %v5056_v37 = vld [vmem:[%s6163_s9 + $0x12c] ss:$24 sps:$4 sm:$0xff]   ;;  %v5058_v40 = vld [vmem:[%s6163_s9 + $0x128] ss:$24 sps:$4 sm:$0xff]   ;;  %v5062_v42 = vld [vmem:[%s6163_s9 + $0x15c] ss:$24 sps:$4 sm:$0xff]  }
  0xaf   : > { %791 = vmatpush1.bf16.msra.mxu1 %v5034_v20  ;;  %v5029_v41 = vld [vmem:[%s6163_s9 + $0x40] ss:$24 sps:$4 sm:$0xff]   ;;  %v5037_v43 = vld [vmem:[%s6163_s9 + $0x74] ss:$24 sps:$4 sm:$0xff]   ;;  %v5035_v45 = vld [vmem:[%s6163_s9 + $0x70] ss:$24 sps:$4 sm:$0xff]  }
  0xb0   : > { %792 = vmatprep.subr.bf16.mxu1 %v5038_v23  ;;  %v5064_v44 = vld [vmem:[%s6163_s9 + $0x158] ss:$24 sps:$4 sm:$0xff]   ;;  %v5043_v46 = vld [vmem:[%s6163_s9 + $0xa4] ss:$24 sps:$4 sm:$0xff]   ;;  %v5049_v48 = vld [vmem:[%s6163_s9 + $0xd4] ss:$24 sps:$4 sm:$0xff]  }
  0xb1   : > { %750 = vmatpush1.bf16.msra.mxu0 %v5007_v9  ;;  %v5041_v47 = vld [vmem:[%s6163_s9 + $0xa0] ss:$24 sps:$4 sm:$0xff]   ;;  %v5047_v49 = vld [vmem:[%s6163_s9 + $0xd0] ss:$24 sps:$4 sm:$0xff]   ;;  %v5055_v50 = vld [vmem:[%s6163_s9 + $0x104] ss:$24 sps:$4 sm:$0xff]  }
  0xb2   : > { %751 = vmatprep.subr.bf16.mxu0 %v5008_v12  ;;  %v5053_v51 = vld [vmem:[%s6163_s9 + $0x100] ss:$24 sps:$4 sm:$0xff]   ;;  %v5061_v52 = vld [vmem:[%s6163_s9 + $0x134] ss:$24 sps:$4 sm:$0xff]   ;;  %v5059_v53 = vld [vmem:[%s6163_s9 + $0x130] ss:$24 sps:$4 sm:$0xff]  }
  0xb3   : > { %793 = vmatpush1.bf16.msra.mxu1 %v5040_v27  ;;  %v5067_v54 = vld [vmem:[%s6163_s9 + $0x164] ss:$24 sps:$4 sm:$0xff]   ;;  %v5065_v55 = vld [vmem:[%s6163_s9 + $0x160] ss:$24 sps:$4 sm:$0xff]   ;;  %v445_v4 = vld [vmem:[#allocation2 + $0x10] sm:$0xff]  ;;  %s6358_s26 = sld [smem:[#allocation17_spill]] (!%p4382_p5) }
  0xb4   : > { %794 = vmatprep.subr.bf16.mxu1 %v5044_v28  ;;  %v443_v56 = vld [vmem:[#allocation2] sm:$0xff]  ;;  %v450_v62 = vld [vmem:[#allocation2 + $0x38] sm:$0xff]  ;;  %v452_v10 = vld [vmem:[#allocation2 + $0x48] sm:$0xff] }
  0xb5   : > { %752 = vmatpush1.bf16.msra.mxu0 %v5010_v13  ;;  %v446_v5 = vld [vmem:[#allocation2 + $0x18] sm:$0xff]  ;;  %v451_v7 = vld [vmem:[#allocation2 + $0x40] sm:$0xff]  ;;  %v453_v20 = vld [vmem:[#allocation2 + $0x50] sm:$0xff] }
  0xb6   : > { %753 = vmatprep.subr.bf16.mxu0 %v5011_v17  ;;  %v447_v16 = vld [vmem:[#allocation2 + $0x20] sm:$0xff]  ;;  %v448_v17 = vld [vmem:[#allocation2 + $0x28] sm:$0xff]  ;;  %v454_v23 = vld [vmem:[#allocation2 + $0x58] sm:$0xff] }
  0xb7   : > { %795 = vmatpush1.bf16.msra.mxu1 %v5046_v31  ;;  %v913_v31 = vld [vmem:[%s6329_s3 + $0x8] sm:$0xff] (!%p4382_p5)  ;;  %v5073_v34 = vld [vmem:[#allocation9] ss:$16 sps:$4 sm:$0xff] (!%p4382_p5)  }
  0xb8   : > { %796 = vmatprep.subr.bf16.mxu1 %v5050_v32  ;;  %v5069_v32 = vld [vmem:[#allocation9 + $0x4] ss:$16 sps:$4 sm:$0xff] (!%p4382_p5)  }
  0xb9   : > { %754 = vmatpush1.bf16.msra.mxu0 %v5013_v21 }
  0xba   : > { %755 = vmatprep.subr.bf16.mxu0 %v5014_v22 }
  0xbb   : > { %797 = vmatpush1.bf16.msra.mxu1 %v5052_v36  ;;  %v5075_v36 = vld [vmem:[#allocation9 + $0x24] ss:$16 sps:$4 sm:$0xff] (!%p4382_p5)  }
  0xbc   : > { %798 = vmatprep.subr.bf16.mxu1 %v5056_v37  ;;  %v5077_v37 = vld [vmem:[#allocation9 + $0x2c] ss:$16 sps:$4 sm:$0xff] (!%p4382_p5)  }
  0xbd   : > { %756 = vmatpush1.bf16.msra.mxu0 %v5016_v24 }
  0xbe   : > { %757 = vmatprep.subr.bf16.mxu0 %v5017_v29  ;;  %v912_v29 = vld [vmem:[%s6329_s3] sm:$0xff] (!%p4382_p5) }
  0xbf   : > { %799 = vmatpush1.bf16.msra.mxu1 %v5058_v40  ;;  %v5081_v40 = vld [vmem:[#allocation9 + $0x44] ss:$16 sps:$4 sm:$0xff] (!%p4382_p5)  }
  0xc0   : > { %800 = vmatprep.subr.bf16.mxu1 %v5062_v42  ;;  %v5085_v42 = vld [vmem:[#allocation9 + $0x40] ss:$16 sps:$4 sm:$0xff] (!%p4382_p5)  }
  0xc1   : > { %758 = vmatpush1.bf16.msra.mxu0 %v5019_v30  ;;  %v5924_v30 = vmov (!%p4382_p5), 0  }
  0xc2   : > { %829 = vmatprep.subr.bf16.mxu0 %v5025_v33  ;;  %5068 = vset.pattern.permute.xlu0 (!%p4382_p5), %v5924_v30  ;;  %v5071_v33 = vld [vmem:[#allocation9 + $0xc] ss:$16 sps:$4 sm:$0xff] (!%p4382_p5)  }
  0xc3   : > { %801 = vmatpush1.bf16.msra.mxu1 %v5064_v44  ;;  %916 = vperm.xlu0 (!%p4382_p5), %5068, %v912_v29   ;;  %v5087_v44 = vld [vmem:[#allocation9 + $0x64] ss:$16 sps:$4 sm:$0xff] (!%p4382_p5)   ;;  %v5161_v30 = vld [vmem:[#allocation9 + $0x1ec] ss:$16 sps:$4 sm:$0xff] (!%p4382_p5)  }
  0xc4   : > { %4377 = vmatmul.mubr.msk.bf16.vlgmr.msra.gmra.mrb[0].mxu0 %vm6226_vm2, %v5923_v39  ;;  %2421 = vmatprep.subr.bf16.mxu1 (!%p4382_p5), %v5071_v33  ;;  %v5159_v29 = vld [vmem:[#allocation9 + $0x1e4] ss:$16 sps:$4 sm:$0xff] (!%p4382_p5)  }
  0xc5   : > { %830 = vmatpush1.bf16.msra.mxu0 %v5023_v35  ;;  %861 = vmatprep.mubr.bf16.mxu0 %v5922_v3  ;;  %v5074_v35 = vld [vmem:[#allocation9 + $0x8] ss:$16 sps:$4 sm:$0xff] (!%p4382_p5)   ;;  %v5167_v33 = vld [vmem:[#allocation9 + $0x204] ss:$16 sps:$4 sm:$0xff] (!%p4382_p5)  }
  0xc6   : > { %831 = vmatprep.subr.bf16.mxu0 %v5031_v38  ;;  %4379 = vmatmul.mubr.msk.bf16.vlgmr.msra.gmra.mrb[0].mxu1 %vm6226_vm2, %v5923_v39  ;;  %v5079_v38 = vld [vmem:[#allocation9 + $0x20] ss:$16 sps:$4 sm:$0xff] (!%p4382_p5)  }
  0xc7   : > { %2422 = vmatpush1.bf16.msra.mxu1 (!%p4382_p5), %v5074_v35  ;;  %921 = vperm.xlu0 (!%p4382_p5), %5068, %v913_v31   ;;  %v5163_v31 = vld [vmem:[#allocation9 + $0x1e0] ss:$16 sps:$4 sm:$0xff] (!%p4382_p5)  }
  0xc8   : > { %2423 = vmatprep.subr.bf16.mxu1 (!%p4382_p5), %v5077_v37 }
  0xc9   : > { %832 = vmatpush1.bf16.msra.mxu0 %v5029_v41  ;;  %v5083_v41 = vld [vmem:[#allocation9 + $0x4c] ss:$16 sps:$4 sm:$0xff] (!%p4382_p5)  }
  0xca   : > { %833 = vmatprep.subr.bf16.mxu0 %v5037_v43  ;;  %v5086_v43 = vld [vmem:[#allocation9 + $0x48] ss:$16 sps:$4 sm:$0xff] (!%p4382_p5)  }
  0xcd   : > { %834 = vmatpush1.bf16.msra.mxu0 %v5035_v45  ;;  %v5089_v45 = vld [vmem:[#allocation9 + $0x6c] ss:$16 sps:$4 sm:$0xff] (!%p4382_p5)  }
  0xce   : > { %835 = vmatprep.subr.bf16.mxu0 %v5043_v46  ;;  %v5091_v46 = vld [vmem:[#allocation9 + $0x60] ss:$16 sps:$4 sm:$0xff] (!%p4382_p5)  }
  0xd1   : > { %836 = vmatpush1.bf16.msra.mxu0 %v5041_v47  ;;  %v5092_v47 = vld [vmem:[#allocation9 + $0x68] ss:$16 sps:$4 sm:$0xff] (!%p4382_p5)  }
  0xd2   : > { %837 = vmatprep.subr.bf16.mxu0 %v5049_v48  ;;  %v5093_v48 = vld [vmem:[#allocation9 + $0x84] ss:$16 sps:$4 sm:$0xff] (!%p4382_p5)  }
  0xd5   : > { %838 = vmatpush1.bf16.msra.mxu0 %v5047_v49  ;;  %v5095_v49 = vld [vmem:[#allocation9 + $0x8c] ss:$16 sps:$4 sm:$0xff] (!%p4382_p5)  }
  0xd6   : > { %839 = vmatprep.subr.bf16.mxu0 %v5055_v50  ;;  %v5097_v50 = vld [vmem:[#allocation9 + $0x80] ss:$16 sps:$4 sm:$0xff] (!%p4382_p5)  }
  0xd9   : > { %840 = vmatpush1.bf16.msra.mxu0 %v5053_v51  ;;  %v5098_v51 = vld [vmem:[#allocation9 + $0x88] ss:$16 sps:$4 sm:$0xff] (!%p4382_p5)  }
  0xda   : > { %841 = vmatprep.subr.bf16.mxu0 %v5061_v52  ;;  %v5099_v52 = vld [vmem:[#allocation9 + $0xa4] ss:$16 sps:$4 sm:$0xff] (!%p4382_p5)  }
  0xdd   : > { %842 = vmatpush1.bf16.msra.mxu0 %v5059_v53  ;;  %v5101_v53 = vld [vmem:[#allocation9 + $0xac] ss:$16 sps:$4 sm:$0xff] (!%p4382_p5)  }
  0xde   : > { %843 = vmatprep.subr.bf16.mxu0 %v5067_v54  ;;  %v5103_v54 = vld [vmem:[#allocation9 + $0xa0] ss:$16 sps:$4 sm:$0xff] (!%p4382_p5)  }
  0xe1   : > { %844 = vmatpush1.bf16.msra.mxu0 %v5065_v55  ;;  %v5104_v55 = vld [vmem:[#allocation9 + $0xa8] ss:$16 sps:$4 sm:$0xff] (!%p4382_p5)  }
  0xe2   : > { %2292 = vmatprep.subr.bf16.mxu0 (!%p4382_p5), %v5069_v32  ;;  %v5164_v32 = vld [vmem:[#allocation9 + $0x1e8] ss:$16 sps:$4 sm:$0xff] (!%p4382_p5)  }
  0xe4   : > { %4381 = vmatmul.mubr.msk.bf16.vlgmr.msra.gmra.mrb[4].mxu0 %vm6226_vm2, %v5923_v39  ;;  %v5080_v39 = vld [vmem:[#allocation9 + $0x28] ss:$16 sps:$4 sm:$0xff] (!%p4382_p5)  }
  0xe5   : > { %2293 = vmatpush1.bf16.msra.mxu0 (!%p4382_p5), %v5073_v34  ;;  %2424 = vmatpush1.bf16.msra.mxu1 (!%p4382_p5), %v5080_v39  ;;  %v5170_v34 = vld [vmem:[#allocation9 + $0x20c] ss:$16 sps:$4 sm:$0xff] (!%p4382_p5)  }
  0xe6   : > { %2294 = vmatprep.subr.bf16.mxu0 (!%p4382_p5), %v5075_v36  ;;  %2425 = vmatprep.subr.bf16.mxu1 (!%p4382_p5), %v5083_v41 }
  0xe9   : > { %2295 = vmatpush1.bf16.msra.mxu0 (!%p4382_p5), %v5079_v38  ;;  %2426 = vmatpush1.bf16.msra.mxu1 (!%p4382_p5), %v5086_v43 }
  0xea   : > { %2296 = vmatprep.subr.bf16.mxu0 (!%p4382_p5), %v5081_v40  ;;  %2427 = vmatprep.subr.bf16.mxu1 (!%p4382_p5), %v5089_v45  ;;  %v5168_v45 = vld [vmem:[#allocation9 + $0x208] ss:$16 sps:$4 sm:$0xff] (!%p4382_p5)  }
  0xed   : > { %2297 = vmatpush1.bf16.msra.mxu0 (!%p4382_p5), %v5085_v42  ;;  %2428 = vmatpush1.bf16.msra.mxu1 (!%p4382_p5), %v5092_v47 }
  0xee   : > { %2298 = vmatprep.subr.bf16.mxu0 (!%p4382_p5), %v5087_v44  ;;  %2429 = vmatprep.subr.bf16.mxu1 (!%p4382_p5), %v5095_v49  ;;  %v5165_v44 = vld [vmem:[#allocation9 + $0x200] ss:$16 sps:$4 sm:$0xff] (!%p4382_p5)  }
  0xf1   : > { %2299 = vmatpush1.bf16.msra.mxu0 (!%p4382_p5), %v5091_v46  ;;  %2430 = vmatpush1.bf16.msra.mxu1 (!%p4382_p5), %v5098_v51 }
  0xf2   : > { %2300 = vmatprep.subr.bf16.mxu0 (!%p4382_p5), %v5093_v48  ;;  %2431 = vmatprep.subr.bf16.mxu1 (!%p4382_p5), %v5101_v53  ;;  %v5173_v53 = vld [vmem:[#allocation9 + $0x224] ss:$16 sps:$4 sm:$0xff] (!%p4382_p5)  }
  0xf5   : > { %2301 = vmatpush1.bf16.msra.mxu0 (!%p4382_p5), %v5097_v50  ;;  %2432 = vmatpush1.bf16.msra.mxu1 (!%p4382_p5), %v5104_v55 }
  0xf6   : > { %2302 = vmatprep.subr.bf16.mxu0 (!%p4382_p5), %v5099_v52 }
  0xf9   : > { %2303 = vmatpush1.bf16.msra.mxu0 (!%p4382_p5), %v5103_v54  ;;  %v5176_v54 = vld [vmem:[#allocation9 + $0x22c] ss:$16 sps:$4 sm:$0xff] (!%p4382_p5)  }
 0x142   : > { %v6264_v35 = vpop.permute.xlu0 (!%p4382_p5), %916 }
 0x146   : > { %v6266_v41 = vpop.permute.xlu0 (!%p4382_p5), %921 }
 0x197   : > { %v777_v58 = vpop.f32.mrb[0].mxu0 }
 0x198   : > { %v872_v60 = vadd.f32 %v777_v58, %v443_v56  ;;  %v779_v61 = vpop.f32.mrb[1].mxu0  ;;  %v5105_v56 = vld [vmem:[#allocation9 + $0xc4] ss:$16 sps:$4 sm:$0xff] (!%p4382_p5)   ;;  %v5109_v58 = vld [vmem:[#allocation9 + $0xc0] ss:$16 sps:$4 sm:$0xff] (!%p4382_p5)  }
 0x199   : > { %v873_v63 = vadd.f32 %v779_v61, %v444_v57  ;;  %v781_v0 = vpop.f32.mrb[2].mxu0  ;;  %v820_v6 = vpop.f32.mrb[0].mxu1  ;;  %v5107_v57 = vld [vmem:[#allocation9 + $0xcc] ss:$16 sps:$4 sm:$0xff] (!%p4382_p5)   ;;  %2304 = vmatprep.subr.bf16.mxu0 (!%p4382_p5), %v5105_v56  ;;  %v5171_v56 = vld [vmem:[#allocation9 + $0x220] ss:$16 sps:$4 sm:$0xff] (!%p4382_p5)  }
 0x19a   : > { %884 = vst [vmem:[#allocation2] sm:$0xff] %v872_v60  ;;  %v878_v1 = vadd.f32 %v781_v0, %v449_v59  ;;  %v783_v2 = vpop.f32.mrb[3].mxu0  ;;  %v874_v8 = vadd.f32 %v820_v6, %v445_v4  ;;  %v822_v9 = vpop.f32.mrb[1].mxu1  ;;  %v5110_v59 = vld [vmem:[#allocation9 + $0xc8] ss:$16 sps:$4 sm:$0xff] (!%p4382_p5)   ;;  %2433 = vmatprep.subr.bf16.mxu1 (!%p4382_p5), %v5107_v57  ;;  %2305 = vmatpush1.bf16.msra.mxu0 (!%p4382_p5), %v5109_v58 }
 0x19b   : > { %885 = vst [vmem:[#allocation2 + $0x8] sm:$0xff] %v873_v63  ;;  %v879_v3 = vadd.f32 %v783_v2, %v450_v62  ;;  %v875_v11 = vadd.f32 %v822_v9, %v446_v5  ;;  %v824_v12 = vpop.f32.mrb[2].mxu1  ;;  %v5111_v60 = vld [vmem:[#allocation9 + $0xe4] ss:$16 sps:$4 sm:$0xff] (!%p4382_p5)   ;;  %v5113_v61 = vld [vmem:[#allocation9 + $0xec] ss:$16 sps:$4 sm:$0xff] (!%p4382_p5)   ;;  %2434 = vmatpush1.bf16.msra.mxu1 (!%p4382_p5), %v5110_v59 }
 0x19c   : > { %890 = vst [vmem:[#allocation2 + $0x30] sm:$0xff] %v878_v1  ;;  %886 = vst [vmem:[#allocation2 + $0x10] sm:$0xff] %v874_v8  ;;  %v880_v13 = vadd.f32 %v824_v12, %v451_v7  ;;  %v826_v14 = vpop.f32.mrb[3].mxu1  ;;  %v5115_v62 = vld [vmem:[#allocation9 + $0xe0] ss:$16 sps:$4 sm:$0xff] (!%p4382_p5)   ;;  %2306 = vmatprep.subr.bf16.mxu0 (!%p4382_p5), %v5111_v60  ;;  %2435 = vmatprep.subr.bf16.mxu1 (!%p4382_p5), %v5113_v61 }
 0x19d   : > { %891 = vst [vmem:[#allocation2 + $0x38] sm:$0xff] %v879_v3  ;;  %887 = vst [vmem:[#allocation2 + $0x18] sm:$0xff] %v875_v11  ;;  %v881_v15 = vadd.f32 %v826_v14, %v452_v10  ;;  %v5116_v63 = vld [vmem:[#allocation9 + $0xe8] ss:$16 sps:$4 sm:$0xff] (!%p4382_p5)   ;;  %v5117_v0 = vld [vmem:[#allocation9 + $0x104] ss:$16 sps:$4 sm:$0xff] (!%p4382_p5)  }
 0x19e   : > { %892 = vst [vmem:[#allocation2 + $0x40] sm:$0xff] %v880_v13  ;;  %v5119_v1 = vld [vmem:[#allocation9 + $0x10c] ss:$16 sps:$4 sm:$0xff] (!%p4382_p5)   ;;  %2307 = vmatpush1.bf16.msra.mxu0 (!%p4382_p5), %v5115_v62  ;;  %v5121_v2 = vld [vmem:[#allocation9 + $0x100] ss:$16 sps:$4 sm:$0xff] (!%p4382_p5)  }
 0x19f   : > { %893 = vst [vmem:[#allocation2 + $0x48] sm:$0xff] %v881_v15  ;;  %v5122_v3 = vld [vmem:[#allocation9 + $0x108] ss:$16 sps:$4 sm:$0xff] (!%p4382_p5)   ;;  %2436 = vmatpush1.bf16.msra.mxu1 (!%p4382_p5), %v5116_v63  ;;  %2308 = vmatprep.subr.bf16.mxu0 (!%p4382_p5), %v5117_v0  ;;  %v5123_v4 = vld [vmem:[#allocation9 + $0x124] ss:$16 sps:$4 sm:$0xff] (!%p4382_p5)  }
 0x1a0   : > { %2437 = vmatprep.subr.bf16.mxu1 (!%p4382_p5), %v5119_v1  ;;  %v5125_v5 = vld [vmem:[#allocation9 + $0x12c] ss:$16 sps:$4 sm:$0xff] (!%p4382_p5)   ;;  %v5127_v6 = vld [vmem:[#allocation9 + $0x120] ss:$16 sps:$4 sm:$0xff] (!%p4382_p5)   ;;  %v5128_v7 = vld [vmem:[#allocation9 + $0x128] ss:$16 sps:$4 sm:$0xff] (!%p4382_p5)  }
 0x1a1   : > { %v5129_v8 = vld [vmem:[#allocation9 + $0x144] ss:$16 sps:$4 sm:$0xff] (!%p4382_p5)   ;;  %v5131_v9 = vld [vmem:[#allocation9 + $0x14c] ss:$16 sps:$4 sm:$0xff] (!%p4382_p5)   ;;  %v5133_v10 = vld [vmem:[#allocation9 + $0x140] ss:$16 sps:$4 sm:$0xff] (!%p4382_p5)  }
 0x1a2   : > { %2309 = vmatpush1.bf16.msra.mxu0 (!%p4382_p5), %v5121_v2  ;;  %v5134_v11 = vld [vmem:[#allocation9 + $0x148] ss:$16 sps:$4 sm:$0xff] (!%p4382_p5)   ;;  %v5135_v12 = vld [vmem:[#allocation9 + $0x164] ss:$16 sps:$4 sm:$0xff] (!%p4382_p5)   ;;  %v5137_v13 = vld [vmem:[#allocation9 + $0x16c] ss:$16 sps:$4 sm:$0xff] (!%p4382_p5)  }
 0x1a3   : > { %2438 = vmatpush1.bf16.msra.mxu1 (!%p4382_p5), %v5122_v3  ;;  %2310 = vmatprep.subr.bf16.mxu0 (!%p4382_p5), %v5123_v4  ;;  %v5139_v14 = vld [vmem:[#allocation9 + $0x160] ss:$16 sps:$4 sm:$0xff] (!%p4382_p5)   ;;  %v5140_v15 = vld [vmem:[#allocation9 + $0x168] ss:$16 sps:$4 sm:$0xff] (!%p4382_p5)   ;;  %v5179_v58 = vld [vmem:[#allocation9 + $0x244] ss:$16 sps:$4 sm:$0xff] (!%p4382_p5)  }
 0x1a4   : > { %2439 = vmatprep.subr.bf16.mxu1 (!%p4382_p5), %v5125_v5  ;;  %v901_v36 = vld [vmem:[#allocation2 + $0x8] sm:$0xff] (!%p4382_p5)  ;;  %v907_v37 = vld [vmem:[#allocation2 + $0x38] sm:$0xff] (!%p4382_p5)  ;;  %v900_v38 = vld [vmem:[#allocation2] sm:$0xff] (!%p4382_p5) }
 0x1a5   : > { %v906_v39 = vld [vmem:[#allocation2 + $0x30] sm:$0xff] (!%p4382_p5)  ;;  %v925_v42 = vmul.f32 (!%p4382_p5), %v6264_v35, %v901_v36  ;;  %v931_v43 = vmul.f32 (!%p4382_p5), %v6266_v41, %v907_v37  ;;  %v924_v46 = vmul.f32 (!%p4382_p5), %v6264_v35, %v900_v38  ;;  %v903_v48 = vld [vmem:[#allocation2 + $0x18] sm:$0xff] (!%p4382_p5) }
 0x1a6   : > { %2311 = vmatpush1.bf16.msra.mxu0 (!%p4382_p5), %v5127_v6  ;;  %v909_v40 = vld [vmem:[#allocation2 + $0x48] sm:$0xff] (!%p4382_p5)  ;;  %v930_v47 = vmul.f32 (!%p4382_p5), %v6266_v41, %v906_v39  ;;  %v927_v52 = vmul.f32 (!%p4382_p5), %v6264_v35, %v903_v48  ;;  %v5177_v60 = vld [vmem:[#allocation9 + $0x240] ss:$16 sps:$4 sm:$0xff] (!%p4382_p5)   ;;  %v5185_v62 = vld [vmem:[#allocation9 + $0x264] ss:$16 sps:$4 sm:$0xff] (!%p4382_p5)  }
 0x1a7   : > { %2440 = vmatpush1.bf16.msra.mxu1 (!%p4382_p5), %v5128_v7  ;;  %2312 = vmatprep.subr.bf16.mxu0 (!%p4382_p5), %v5129_v8  ;;  %v933_v49 = vmul.f32 (!%p4382_p5), %v6266_v41, %v909_v40  ;;  %v1135_v50 = vpack.c.bf16 (!%p4382_p5), %v931_v43, %v925_v42  ;;  %v5174_v57 = vld [vmem:[#allocation9 + $0x228] ss:$16 sps:$4 sm:$0xff] (!%p4382_p5)   ;;  %v5182_v59 = vld [vmem:[#allocation9 + $0x24c] ss:$16 sps:$4 sm:$0xff] (!%p4382_p5)   ;;  %v5183_v0 = vld [vmem:[#allocation9 + $0x260] ss:$16 sps:$4 sm:$0xff] (!%p4382_p5)  }
 0x1a8   : > { %2441 = vmatprep.subr.bf16.mxu1 (!%p4382_p5), %v5131_v9  ;;  %v1134_v51 = vpack.c.bf16 (!%p4382_p5), %v930_v47, %v924_v46  ;;  %v5180_v61 = vld [vmem:[#allocation9 + $0x248] ss:$16 sps:$4 sm:$0xff] (!%p4382_p5)   ;;  %v5188_v63 = vld [vmem:[#allocation9 + $0x26c] ss:$16 sps:$4 sm:$0xff] (!%p4382_p5)   ;;  %v5191_v2 = vld [vmem:[#allocation9 + $0x284] ss:$16 sps:$4 sm:$0xff] (!%p4382_p5)  }
 0x1a9   : > { %2324 = vmatprep.mubr.bf16.mxu0 (!%p4382_p5), %v1135_v50  ;;  %2453 = vmatprep.mubr.bf16.mxu1 (!%p4382_p5), %v1135_v50  ;;  %v1137_v55 = vpack.c.bf16 (!%p4382_p5), %v933_v49, %v927_v52  ;;  %v5186_v1 = vld [vmem:[#allocation9 + $0x268] ss:$16 sps:$4 sm:$0xff] (!%p4382_p5)   ;;  %v5194_v3 = vld [vmem:[#allocation9 + $0x28c] ss:$16 sps:$4 sm:$0xff] (!%p4382_p5)   ;;  %v5189_v4 = vld [vmem:[#allocation9 + $0x280] ss:$16 sps:$4 sm:$0xff] (!%p4382_p5)  }
 0x1aa   : > { %2313 = vmatpush1.bf16.msra.mxu0 (!%p4382_p5), %v5133_v10  ;;  %v5192_v5 = vld [vmem:[#allocation9 + $0x288] ss:$16 sps:$4 sm:$0xff] (!%p4382_p5)   ;;  %v5197_v6 = vld [vmem:[#allocation9 + $0x2a4] ss:$16 sps:$4 sm:$0xff] (!%p4382_p5)   ;;  %v5200_v7 = vld [vmem:[#allocation9 + $0x2ac] ss:$16 sps:$4 sm:$0xff] (!%p4382_p5)  }
 0x1ab   : > { %2442 = vmatpush1.bf16.msra.mxu1 (!%p4382_p5), %v5134_v11  ;;  %2314 = vmatprep.subr.bf16.mxu0 (!%p4382_p5), %v5135_v12  ;;  %v5195_v8 = vld [vmem:[#allocation9 + $0x2a0] ss:$16 sps:$4 sm:$0xff] (!%p4382_p5)   ;;  %v5198_v9 = vld [vmem:[#allocation9 + $0x2a8] ss:$16 sps:$4 sm:$0xff] (!%p4382_p5)   ;;  %v5203_v10 = vld [vmem:[#allocation9 + $0x2c4] ss:$16 sps:$4 sm:$0xff] (!%p4382_p5)  }
 0x1ac   : > { %2443 = vmatprep.subr.bf16.mxu1 (!%p4382_p5), %v5137_v13  ;;  %v5206_v11 = vld [vmem:[#allocation9 + $0x2cc] ss:$16 sps:$4 sm:$0xff] (!%p4382_p5)   ;;  %v5201_v12 = vld [vmem:[#allocation9 + $0x2c0] ss:$16 sps:$4 sm:$0xff] (!%p4382_p5)   ;;  %v5204_v13 = vld [vmem:[#allocation9 + $0x2c8] ss:$16 sps:$4 sm:$0xff] (!%p4382_p5)  }
 0x1ad   : > { %v5239_v36 = vld [vmem:[#allocation9 + $0x384] ss:$16 sps:$4 sm:$0xff] (!%p4382_p5)   ;;  %v5242_v37 = vld [vmem:[#allocation9 + $0x38c] ss:$16 sps:$4 sm:$0xff] (!%p4382_p5)   ;;  %v5237_v38 = vld [vmem:[#allocation9 + $0x380] ss:$16 sps:$4 sm:$0xff] (!%p4382_p5)  }
 0x1ae   : > { %2315 = vmatpush1.bf16.msra.mxu0 (!%p4382_p5), %v5139_v14  ;;  %v5209_v14 = vld [vmem:[#allocation9 + $0x2e4] ss:$16 sps:$4 sm:$0xff] (!%p4382_p5)   ;;  %v5240_v39 = vld [vmem:[#allocation9 + $0x388] ss:$16 sps:$4 sm:$0xff] (!%p4382_p5)   ;;  %v5248_v42 = vld [vmem:[#allocation9 + $0x3ac] ss:$16 sps:$4 sm:$0xff] (!%p4382_p5)  }
 0x1af   : > { %2444 = vmatpush1.bf16.msra.mxu1 (!%p4382_p5), %v5140_v15  ;;  %v5212_v15 = vld [vmem:[#allocation9 + $0x2ec] ss:$16 sps:$4 sm:$0xff] (!%p4382_p5)   ;;  %v5245_v40 = vld [vmem:[#allocation9 + $0x3a4] ss:$16 sps:$4 sm:$0xff] (!%p4382_p5)   ;;  %v5243_v43 = vld [vmem:[#allocation9 + $0x3a0] ss:$16 sps:$4 sm:$0xff] (!%p4382_p5)  }
 0x1b0   : > { %v5254_v46 = vld [vmem:[#allocation9 + $0x3cc] ss:$16 sps:$4 sm:$0xff] (!%p4382_p5)   ;;  %v5249_v47 = vld [vmem:[#allocation9 + $0x3c0] ss:$16 sps:$4 sm:$0xff] (!%p4382_p5)   ;;  %v5252_v48 = vld [vmem:[#allocation9 + $0x3c8] ss:$16 sps:$4 sm:$0xff] (!%p4382_p5)  }
 0x1b1   : > { %v5257_v49 = vld [vmem:[#allocation9 + $0x3e4] ss:$16 sps:$4 sm:$0xff] (!%p4382_p5)   ;;  %v5260_v50 = vld [vmem:[#allocation9 + $0x3ec] ss:$16 sps:$4 sm:$0xff] (!%p4382_p5)   ;;  %v5255_v52 = vld [vmem:[#allocation9 + $0x3e0] ss:$16 sps:$4 sm:$0xff] (!%p4382_p5)  }
 0x1b7   : > { %v863_v18 = vpop.f32.mrb[4].mxu0  ;;  %899 = sbr.rel (%p4382_p5) target bundleno = 1535 (0x5ff), region = 84 }
 0x1b8   : > { %v876_v21 = vadd.f32 %v863_v18, %v447_v16  ;;  %v865_v22 = vpop.f32.mrb[5].mxu0  ;;  %v5141_v16 = vld [vmem:[#allocation9 + $0x184] ss:$16 sps:$4 sm:$0xff] (!%p4382_p5)   ;;  %v5145_v18 = vld [vmem:[#allocation9 + $0x180] ss:$16 sps:$4 sm:$0xff] (!%p4382_p5)  }
 0x1b9   : > { %v877_v24 = vadd.f32 %v865_v22, %v448_v17  ;;  %v867_v25 = vpop.f32.mrb[6].mxu0  ;;  %v5143_v17 = vld [vmem:[#allocation9 + $0x18c] ss:$16 sps:$4 sm:$0xff] (!%p4382_p5)   ;;  %2316 = vmatprep.subr.bf16.mxu0 (!%p4382_p5), %v5141_v16  ;;  %v5207_v16 = vld [vmem:[#allocation9 + $0x2e0] ss:$16 sps:$4 sm:$0xff] (!%p4382_p5)  }
 0x1ba   : > { %888 = vst [vmem:[#allocation2 + $0x20] sm:$0xff] %v876_v21  ;;  %v882_v26 = vadd.f32 %v867_v25, %v453_v20  ;;  %v869_v27 = vpop.f32.mrb[7].mxu0  ;;  %v5146_v20 = vld [vmem:[#allocation9 + $0x188] ss:$16 sps:$4 sm:$0xff] (!%p4382_p5)   ;;  %v5147_v21 = vld [vmem:[#allocation9 + $0x1a4] ss:$16 sps:$4 sm:$0xff] (!%p4382_p5)   ;;  %2445 = vmatprep.subr.bf16.mxu1 (!%p4382_p5), %v5143_v17  ;;  %2317 = vmatpush1.bf16.msra.mxu0 (!%p4382_p5), %v5145_v18 }
 0x1bb   : > { %889 = vst [vmem:[#allocation2 + $0x28] sm:$0xff] %v877_v24  ;;  %v883_v28 = vadd.f32 %v869_v27, %v454_v23  ;;  %v5149_v22 = vld [vmem:[#allocation9 + $0x1ac] ss:$16 sps:$4 sm:$0xff] (!%p4382_p5)   ;;  %v5151_v23 = vld [vmem:[#allocation9 + $0x1a0] ss:$16 sps:$4 sm:$0xff] (!%p4382_p5)   ;;  %2446 = vmatpush1.bf16.msra.mxu1 (!%p4382_p5), %v5146_v20  ;;  %2318 = vmatprep.subr.bf16.mxu0 (!%p4382_p5), %v5147_v21 }
 0x1bc   : > { %894 = vst [vmem:[#allocation2 + $0x50] sm:$0xff] %v882_v26  ;;  %v5152_v24 = vld [vmem:[#allocation9 + $0x1a8] ss:$16 sps:$4 sm:$0xff] (!%p4382_p5)   ;;  %v5153_v25 = vld [vmem:[#allocation9 + $0x1c4] ss:$16 sps:$4 sm:$0xff] (!%p4382_p5)   ;;  %2447 = vmatprep.subr.bf16.mxu1 (!%p4382_p5), %v5149_v22 }
 0x1bd   : > { %895 = vst [vmem:[#allocation2 + $0x58] sm:$0xff] %v883_v28  ;;  %v5155_v26 = vld [vmem:[#allocation9 + $0x1cc] ss:$16 sps:$4 sm:$0xff] (!%p4382_p5)   ;;  %v5157_v27 = vld [vmem:[#allocation9 + $0x1c0] ss:$16 sps:$4 sm:$0xff] (!%p4382_p5)  }
 0x1be   : > { %2319 = vmatpush1.bf16.msra.mxu0 %v5151_v23  ;;  %v5158_v28 = vld [vmem:[#allocation9 + $0x1c8] ss:$16 sps:$4 sm:$0xff]   ;;  %v5215_v18 = vld [vmem:[#allocation9 + $0x304] ss:$16 sps:$4 sm:$0xff]   ;;  %v5218_v20 = vld [vmem:[#allocation9 + $0x30c] ss:$16 sps:$4 sm:$0xff]  }
 0x1bf   : > { %2448 = vmatpush1.bf16.msra.mxu1 %v5152_v24  ;;  %2320 = vmatprep.subr.bf16.mxu0 %v5153_v25  ;;  %v5210_v17 = vld [vmem:[#allocation9 + $0x2e8] ss:$16 sps:$4 sm:$0xff]   ;;  %v5213_v21 = vld [vmem:[#allocation9 + $0x300] ss:$16 sps:$4 sm:$0xff]   ;;  %v5221_v23 = vld [vmem:[#allocation9 + $0x324] ss:$16 sps:$4 sm:$0xff]  }
 0x1c0   : > { %2449 = vmatprep.subr.bf16.mxu1 %v5155_v26  ;;  %v5216_v22 = vld [vmem:[#allocation9 + $0x308] ss:$16 sps:$4 sm:$0xff]   ;;  %v5224_v24 = vld [vmem:[#allocation9 + $0x32c] ss:$16 sps:$4 sm:$0xff]   ;;  %v5219_v25 = vld [vmem:[#allocation9 + $0x320] ss:$16 sps:$4 sm:$0xff]  }
 0x1c1   : > { %v5222_v26 = vld [vmem:[#allocation9 + $0x328] ss:$16 sps:$4 sm:$0xff]  }
 0x1c2   : > { %2321 = vmatpush1.bf16.msra.mxu0 %v5157_v27  ;;  %v5227_v27 = vld [vmem:[#allocation9 + $0x344] ss:$16 sps:$4 sm:$0xff]  }
 0x1c3   : > { %2450 = vmatpush1.bf16.msra.mxu1 %v5158_v28  ;;  %2322 = vmatprep.subr.bf16.mxu0 %v5159_v29  ;;  %v5230_v28 = vld [vmem:[#allocation9 + $0x34c] ss:$16 sps:$4 sm:$0xff]   ;;  %v5225_v29 = vld [vmem:[#allocation9 + $0x340] ss:$16 sps:$4 sm:$0xff]  }
 0x1c4   : > { %2451 = vmatprep.subr.bf16.mxu1 %v5161_v30  ;;  %v5228_v30 = vld [vmem:[#allocation9 + $0x348] ss:$16 sps:$4 sm:$0xff]  }
 0x1c6   : > { %2323 = vmatpush1.bf16.msra.mxu0 %v5163_v31  ;;  %v5233_v31 = vld [vmem:[#allocation9 + $0x364] ss:$16 sps:$4 sm:$0xff]  }
 0x1c7   : > { %2452 = vmatpush1.bf16.msra.mxu1 %v5164_v32  ;;  %2335 = vmatprep.subr.bf16.mxu0 %v5167_v33  ;;  %v5236_v32 = vld [vmem:[#allocation9 + $0x36c] ss:$16 sps:$4 sm:$0xff]   ;;  %v5231_v33 = vld [vmem:[#allocation9 + $0x360] ss:$16 sps:$4 sm:$0xff]  }
 0x1c8   : > { %2464 = vmatprep.subr.bf16.mxu1 %v5170_v34  ;;  %v5234_v34 = vld [vmem:[#allocation9 + $0x368] ss:$16 sps:$4 sm:$0xff]  }
 0x1c9   : > { %2325 = vmatmul.mubr.bf16.vlgmr.msra.gmra.mrb[0].mxu0 %v1134_v51 }
 0x1ca   : > { %2454 = vmatmul.mubr.bf16.vlgmr.msra.gmra.mrb[0].mxu1 %v1134_v51  ;;  %2336 = vmatpush1.bf16.msra.mxu0 %v5165_v44  ;;  %v5246_v44 = vld [vmem:[#allocation9 + $0x3a8] ss:$16 sps:$4 sm:$0xff]   ;;  %v908_v51 = vld [vmem:[#allocation2 + $0x40] sm:$0xff] }
 0x1cb   : > { %2465 = vmatpush1.bf16.msra.mxu1 %v5168_v45  ;;  %2367 = vmatprep.mubr.bf16.mxu0 %v1137_v55  ;;  %v5251_v45 = vld [vmem:[#allocation9 + $0x3c4] ss:$16 sps:$4 sm:$0xff]  }
 0x1cc   : > { %2496 = vmatprep.mubr.bf16.mxu1 %v1137_v55  ;;  %2337 = vmatprep.subr.bf16.mxu0 %v5173_v53  ;;  %v5258_v53 = vld [vmem:[#allocation9 + $0x3e8] ss:$16 sps:$4 sm:$0xff]  }
 0x1cd   : > { %2466 = vmatprep.subr.bf16.mxu1 %v5176_v54  ;;  %v902_v54 = vld [vmem:[#allocation2 + $0x10] sm:$0xff]  ;;  %v911_v55 = vld [vmem:[#allocation2 + $0x58] sm:$0xff] }
 0x1ce   : > { %2338 = vmatpush1.bf16.msra.mxu0 %v5171_v56  ;;  %v932_v56 = vmul.f32 %v6266_v41, %v908_v51  ;;  %v5333_v51 = vld [vmem:[#allocation9 + $0x580] ss:$16 sps:$4 sm:$0xff]  }
 0x1cf   : > { %2467 = vmatpush1.bf16.msra.mxu1 %v5174_v57  ;;  %2339 = vmatprep.subr.bf16.mxu0 %v5179_v58  ;;  %v5263_v57 = vld [vmem:[#allocation9 + $0x404] ss:$16 sps:$4 sm:$0xff]   ;;  %v5266_v58 = vld [vmem:[#allocation9 + $0x40c] ss:$16 sps:$4 sm:$0xff]  }
 0x1d0   : > { %2468 = vmatprep.subr.bf16.mxu1 %v5182_v59  ;;  %v905_v59 = vld [vmem:[#allocation2 + $0x28] sm:$0xff] }
 0x1d2   : > { %2340 = vmatpush1.bf16.msra.mxu0 %v5177_v60  ;;  %v5261_v60 = vld [vmem:[#allocation9 + $0x400] ss:$16 sps:$4 sm:$0xff]  }
 0x1d3   : > { %2469 = vmatpush1.bf16.msra.mxu1 %v5180_v61  ;;  %2341 = vmatprep.subr.bf16.mxu0 %v5185_v62  ;;  %v935_v61 = vmul.f32 %v6266_v41, %v911_v55  ;;  %v926_v62 = vmul.f32 %v6264_v35, %v902_v54  ;;  %v5341_v54 = vld [vmem:[#allocation9 + $0x5a4] ss:$16 sps:$4 sm:$0xff]   ;;  %v5339_v55 = vld [vmem:[#allocation9 + $0x5a0] ss:$16 sps:$4 sm:$0xff]  }
 0x1d4   : > { %2470 = vmatprep.subr.bf16.mxu1 %v5188_v63  ;;  %v929_v63 = vmul.f32 %v6264_v35, %v905_v59  ;;  %v5345_v59 = vld [vmem:[#allocation9 + $0x5c0] ss:$16 sps:$4 sm:$0xff]  }
 0x1d6   : > { %2342 = vmatpush1.bf16.msra.mxu0 %v5183_v0  ;;  %v1136_v0 = vpack.c.bf16 %v932_v56, %v926_v62  ;;  %v5344_v56 = vld [vmem:[#allocation9 + $0x5ac] ss:$16 sps:$4 sm:$0xff]   ;;  %v5353_v62 = vld [vmem:[#allocation9 + $0x5e4] ss:$16 sps:$4 sm:$0xff]  }
 0x1d7   : > { %2471 = vmatpush1.bf16.msra.mxu1 %v5186_v1  ;;  %2343 = vmatprep.subr.bf16.mxu0 %v5191_v2  ;;  %v5264_v1 = vld [vmem:[#allocation9 + $0x408] ss:$16 sps:$4 sm:$0xff]   ;;  %v1139_v2 = vpack.c.bf16 %v935_v61, %v929_v63  ;;  %v910_v63 = vld [vmem:[#allocation2 + $0x50] sm:$0xff] }
 0x1d8   : > { %2472 = vmatprep.subr.bf16.mxu1 %v5194_v3  ;;  %v5267_v3 = vld [vmem:[#allocation9 + $0x420] ss:$16 sps:$4 sm:$0xff]   ;;  %v5348_v61 = vld [vmem:[#allocation9 + $0x5c8] ss:$16 sps:$4 sm:$0xff]  }
 0x1da   : > { %2344 = vmatpush1.bf16.msra.mxu0 %v5189_v4  ;;  %v5269_v4 = vld [vmem:[#allocation9 + $0x424] ss:$16 sps:$4 sm:$0xff]  }
 0x1db   : > { %2473 = vmatpush1.bf16.msra.mxu1 %v5192_v5  ;;  %2345 = vmatprep.subr.bf16.mxu0 %v5197_v6  ;;  %v5272_v5 = vld [vmem:[#allocation9 + $0x42c] ss:$16 sps:$4 sm:$0xff]   ;;  %v5270_v6 = vld [vmem:[#allocation9 + $0x428] ss:$16 sps:$4 sm:$0xff]  }
 0x1dc   : > { %2474 = vmatprep.subr.bf16.mxu1 %v5200_v7  ;;  %v5275_v7 = vld [vmem:[#allocation9 + $0x444] ss:$16 sps:$4 sm:$0xff]  }
 0x1de   : > { %2346 = vmatpush1.bf16.msra.mxu0 %v5195_v8  ;;  %v5273_v8 = vld [vmem:[#allocation9 + $0x440] ss:$16 sps:$4 sm:$0xff]  }
 0x1df   : > { %2475 = vmatpush1.bf16.msra.mxu1 %v5198_v9  ;;  %2347 = vmatprep.subr.bf16.mxu0 %v5203_v10  ;;  %v5278_v9 = vld [vmem:[#allocation9 + $0x44c] ss:$16 sps:$4 sm:$0xff]   ;;  %v5276_v10 = vld [vmem:[#allocation9 + $0x448] ss:$16 sps:$4 sm:$0xff]  }
 0x1e0   : > { %2476 = vmatprep.subr.bf16.mxu1 %v5206_v11  ;;  %v5281_v11 = vld [vmem:[#allocation9 + $0x464] ss:$16 sps:$4 sm:$0xff]  }
 0x1e2   : > { %2348 = vmatpush1.bf16.msra.mxu0 %v5201_v12  ;;  %v5279_v12 = vld [vmem:[#allocation9 + $0x460] ss:$16 sps:$4 sm:$0xff]  }
 0x1e3   : > { %2477 = vmatpush1.bf16.msra.mxu1 %v5204_v13  ;;  %2349 = vmatprep.subr.bf16.mxu0 %v5209_v14  ;;  %v5284_v13 = vld [vmem:[#allocation9 + $0x46c] ss:$16 sps:$4 sm:$0xff]   ;;  %v5282_v14 = vld [vmem:[#allocation9 + $0x468] ss:$16 sps:$4 sm:$0xff]  }
 0x1e4   : > { %2478 = vmatprep.subr.bf16.mxu1 %v5212_v15  ;;  %v5287_v15 = vld [vmem:[#allocation9 + $0x484] ss:$16 sps:$4 sm:$0xff]  }
 0x1e6   : > { %2350 = vmatpush1.bf16.msra.mxu0 %v5207_v16  ;;  %v5285_v16 = vld [vmem:[#allocation9 + $0x480] ss:$16 sps:$4 sm:$0xff]  }
 0x1e7   : > { %2479 = vmatpush1.bf16.msra.mxu1 %v5210_v17  ;;  %2351 = vmatprep.subr.bf16.mxu0 %v5215_v18  ;;  %v5290_v17 = vld [vmem:[#allocation9 + $0x48c] ss:$16 sps:$4 sm:$0xff]   ;;  %v5288_v18 = vld [vmem:[#allocation9 + $0x488] ss:$16 sps:$4 sm:$0xff]  }
 0x1e8   : > { %2480 = vmatprep.subr.bf16.mxu1 %v5218_v20  ;;  %v5293_v20 = vld [vmem:[#allocation9 + $0x4a4] ss:$16 sps:$4 sm:$0xff]  }
 0x1ea   : > { %2352 = vmatpush1.bf16.msra.mxu0 %v5213_v21  ;;  %v5291_v21 = vld [vmem:[#allocation9 + $0x4a0] ss:$16 sps:$4 sm:$0xff]  }
 0x1eb   : > { %2481 = vmatpush1.bf16.msra.mxu1 %v5216_v22  ;;  %2353 = vmatprep.subr.bf16.mxu0 %v5221_v23  ;;  %v5296_v22 = vld [vmem:[#allocation9 + $0x4ac] ss:$16 sps:$4 sm:$0xff]   ;;  %v5294_v23 = vld [vmem:[#allocation9 + $0x4a8] ss:$16 sps:$4 sm:$0xff]  }
 0x1ec   : > { %2482 = vmatprep.subr.bf16.mxu1 %v5224_v24  ;;  %v5299_v24 = vld [vmem:[#allocation9 + $0x4c4] ss:$16 sps:$4 sm:$0xff]  }
 0x1ee   : > { %2354 = vmatpush1.bf16.msra.mxu0 %v5219_v25  ;;  %v5297_v25 = vld [vmem:[#allocation9 + $0x4c0] ss:$16 sps:$4 sm:$0xff]  }
 0x1ef   : > { %2483 = vmatpush1.bf16.msra.mxu1 %v5222_v26  ;;  %2355 = vmatprep.subr.bf16.mxu0 %v5227_v27  ;;  %v5302_v26 = vld [vmem:[#allocation9 + $0x4cc] ss:$16 sps:$4 sm:$0xff]   ;;  %v5300_v27 = vld [vmem:[#allocation9 + $0x4c8] ss:$16 sps:$4 sm:$0xff]  }
 0x1f0   : > { %2484 = vmatprep.subr.bf16.mxu1 %v5230_v28  ;;  %v5305_v28 = vld [vmem:[#allocation9 + $0x4e4] ss:$16 sps:$4 sm:$0xff]  }
 0x1f2   : > { %2356 = vmatpush1.bf16.msra.mxu0 %v5225_v29  ;;  %v5303_v29 = vld [vmem:[#allocation9 + $0x4e0] ss:$16 sps:$4 sm:$0xff]  }
 0x1f3   : > { %2485 = vmatpush1.bf16.msra.mxu1 %v5228_v30  ;;  %2357 = vmatprep.subr.bf16.mxu0 %v5233_v31  ;;  %v5308_v30 = vld [vmem:[#allocation9 + $0x4ec] ss:$16 sps:$4 sm:$0xff]   ;;  %v5306_v31 = vld [vmem:[#allocation9 + $0x4e8] ss:$16 sps:$4 sm:$0xff]  }
 0x1f4   : > { %2486 = vmatprep.subr.bf16.mxu1 %v5236_v32  ;;  %v5311_v32 = vld [vmem:[#allocation9 + $0x504] ss:$16 sps:$4 sm:$0xff]  }
 0x1f6   : > { %2358 = vmatpush1.bf16.msra.mxu0 %v5231_v33  ;;  %v5309_v33 = vld [vmem:[#allocation9 + $0x500] ss:$16 sps:$4 sm:$0xff]  }
 0x1f7   : > { %2487 = vmatpush1.bf16.msra.mxu1 %v5234_v34  ;;  %2359 = vmatprep.subr.bf16.mxu0 %v5239_v36  ;;  %v5314_v34 = vld [vmem:[#allocation9 + $0x50c] ss:$16 sps:$4 sm:$0xff]   ;;  %v5312_v36 = vld [vmem:[#allocation9 + $0x508] ss:$16 sps:$4 sm:$0xff]  }
 0x1f8   : > { %2488 = vmatprep.subr.bf16.mxu1 %v5242_v37  ;;  %v5317_v37 = vld [vmem:[#allocation9 + $0x524] ss:$16 sps:$4 sm:$0xff]  }
 0x1fa   : > { %2360 = vmatpush1.bf16.msra.mxu0 %v5237_v38  ;;  %v5315_v38 = vld [vmem:[#allocation9 + $0x520] ss:$16 sps:$4 sm:$0xff]  }
 0x1fb   : > { %2489 = vmatpush1.bf16.msra.mxu1 %v5240_v39  ;;  %2361 = vmatprep.subr.bf16.mxu0 %v5245_v40  ;;  %v5320_v39 = vld [vmem:[#allocation9 + $0x52c] ss:$16 sps:$4 sm:$0xff]   ;;  %v5318_v40 = vld [vmem:[#allocation9 + $0x528] ss:$16 sps:$4 sm:$0xff]  }
 0x1fc   : > { %2490 = vmatprep.subr.bf16.mxu1 %v5248_v42  ;;  %v5323_v42 = vld [vmem:[#allocation9 + $0x544] ss:$16 sps:$4 sm:$0xff]  }
 0x1fe   : > { %2362 = vmatpush1.bf16.msra.mxu0 %v5243_v43  ;;  %v5321_v43 = vld [vmem:[#allocation9 + $0x540] ss:$16 sps:$4 sm:$0xff]  }
 0x1ff   : > { %2491 = vmatpush1.bf16.msra.mxu1 %v5246_v44  ;;  %2363 = vmatprep.subr.bf16.mxu0 %v5251_v45  ;;  %v5326_v44 = vld [vmem:[#allocation9 + $0x54c] ss:$16 sps:$4 sm:$0xff]   ;;  %v5324_v45 = vld [vmem:[#allocation9 + $0x548] ss:$16 sps:$4 sm:$0xff]  }
 0x200   : > { %2492 = vmatprep.subr.bf16.mxu1 %v5254_v46  ;;  %v5329_v46 = vld [vmem:[#allocation9 + $0x564] ss:$16 sps:$4 sm:$0xff]  }
 0x202   : > { %2364 = vmatpush1.bf16.msra.mxu0 %v5249_v47  ;;  %v5327_v47 = vld [vmem:[#allocation9 + $0x560] ss:$16 sps:$4 sm:$0xff]  }
 0x203   : > { %2493 = vmatpush1.bf16.msra.mxu1 %v5252_v48  ;;  %2365 = vmatprep.subr.bf16.mxu0 %v5257_v49  ;;  %v5332_v48 = vld [vmem:[#allocation9 + $0x56c] ss:$16 sps:$4 sm:$0xff]   ;;  %v5330_v49 = vld [vmem:[#allocation9 + $0x568] ss:$16 sps:$4 sm:$0xff]  }
 0x204   : > { %2494 = vmatprep.subr.bf16.mxu1 %v5260_v50  ;;  %v5335_v50 = vld [vmem:[#allocation9 + $0x584] ss:$16 sps:$4 sm:$0xff]  }
 0x206   : > { %2366 = vmatpush1.bf16.msra.mxu0 %v5255_v52  ;;  %v5338_v52 = vld [vmem:[#allocation9 + $0x58c] ss:$16 sps:$4 sm:$0xff]  }
 0x207   : > { %2495 = vmatpush1.bf16.msra.mxu1 %v5258_v53  ;;  %2378 = vmatprep.subr.bf16.mxu0 %v5263_v57  ;;  %v5336_v53 = vld [vmem:[#allocation9 + $0x588] ss:$16 sps:$4 sm:$0xff]  }
 0x208   : > { %2507 = vmatprep.subr.bf16.mxu1 %v5266_v58  ;;  %v5342_v57 = vld [vmem:[#allocation9 + $0x5a8] ss:$16 sps:$4 sm:$0xff]   ;;  %v5347_v58 = vld [vmem:[#allocation9 + $0x5c4] ss:$16 sps:$4 sm:$0xff]  }
 0x209   : > { %2368 = vmatmul.mubr.bf16.vlgmr.msra.gmra.mrb[0].mxu0 %v1136_v0 }
 0x20a   : > { %2497 = vmatmul.mubr.bf16.vlgmr.msra.gmra.mrb[0].mxu1 %v1136_v0  ;;  %2379 = vmatpush1.bf16.msra.mxu0 %v5261_v60  ;;  %v5350_v60 = vld [vmem:[#allocation9 + $0x5cc] ss:$16 sps:$4 sm:$0xff]   ;;  %v5351_v0 = vld [vmem:[#allocation9 + $0x5e0] ss:$16 sps:$4 sm:$0xff]  }
 0x20b   : > { %2410 = vmatprep.mubr.bf16.mxu0 %v1139_v2  ;;  %2508 = vmatpush1.bf16.msra.mxu1 %v5264_v1  ;;  %v5356_v1 = vld [vmem:[#allocation9 + $0x5ec] ss:$16 sps:$4 sm:$0xff]  }
 0x20c   : > { %2539 = vmatprep.mubr.bf16.mxu1 %v1139_v2  ;;  %2380 = vmatprep.subr.bf16.mxu0 %v5269_v4  ;;  %v904_v2 = vld [vmem:[#allocation2 + $0x20] sm:$0xff]  ;;  %v934_v4 = vmul.f32 %v6266_v41, %v910_v63  ;;  %v5366_v41 = vld [vmem:[#allocation8 + $0x28] ss:$16 sps:$4 sm:$0xff]  }
 0x20d   : > { %2509 = vmatprep.subr.bf16.mxu1 %v5272_v5  ;;  %v5359_v5 = vld [vmem:[#allocation8 + $0x4] ss:$16 sps:$4 sm:$0xff]   ;;  %v5435_v63 = vld [vmem:[#allocation8 + $0x1a0] ss:$16 sps:$4 sm:$0xff]  }
 0x20e   : > { %2381 = vmatpush1.bf16.msra.mxu0 %v5267_v3  ;;  %v5354_v3 = vld [vmem:[#allocation9 + $0x5e8] ss:$16 sps:$4 sm:$0xff]  }
 0x20f   : > { %2510 = vmatpush1.bf16.msra.mxu1 %v5270_v6  ;;  %2382 = vmatprep.subr.bf16.mxu0 %v5275_v7  ;;  %v5362_v6 = vld [vmem:[#allocation8 + $0xc] ss:$16 sps:$4 sm:$0xff]   ;;  %v928_v7 = vmul.f32 %v6264_v35, %v904_v2 }
 0x210   : > { %2511 = vmatprep.subr.bf16.mxu1 %v5278_v9  ;;  %v5374_v35 = vld [vmem:[#allocation8 + $0x4c] ss:$16 sps:$4 sm:$0xff]  }
 0x211   : > { %v1138_v9 = vpack.c.bf16 %v934_v4, %v928_v7  ;;  %v5446_v2 = vld [vmem:[#allocation8 + $0x1cc] ss:$16 sps:$4 sm:$0xff]   ;;  %v5444_v4 = vld [vmem:[#allocation8 + $0x1c8] ss:$16 sps:$4 sm:$0xff]   ;;  %v5447_v7 = vld [vmem:[#allocation8 + $0x1e0] ss:$16 sps:$4 sm:$0xff]  }
 0x212   : > { %2383 = vmatpush1.bf16.msra.mxu0 %v5273_v8  ;;  %v5357_v8 = vld [vmem:[#allocation8] ss:$16 sps:$4 sm:$0xff]  }
 0x213   : > { %2512 = vmatpush1.bf16.msra.mxu1 %v5276_v10  ;;  %2384 = vmatprep.subr.bf16.mxu0 %v5281_v11  ;;  %v5360_v10 = vld [vmem:[#allocation8 + $0x8] ss:$16 sps:$4 sm:$0xff]   ;;  %v5365_v11 = vld [vmem:[#allocation8 + $0x24] ss:$16 sps:$4 sm:$0xff]  }
 0x214   : > { %2513 = vmatprep.subr.bf16.mxu1 %v5284_v13  ;;  %v5455_v13 = vld [vmem:[#allocation6 + $0x4] ss:$24 sps:$4 sm:$0xff]  }
 0x216   : > { %2385 = vmatpush1.bf16.msra.mxu0 %v5279_v12  ;;  %v5368_v12 = vld [vmem:[#allocation8 + $0x2c] ss:$16 sps:$4 sm:$0xff]  }
 0x217   : > { %2514 = vmatpush1.bf16.msra.mxu1 %v5282_v14  ;;  %2386 = vmatprep.subr.bf16.mxu0 %v5287_v15  ;;  %v5363_v14 = vld [vmem:[#allocation8 + $0x20] ss:$16 sps:$4 sm:$0xff]   ;;  %v5371_v15 = vld [vmem:[#allocation8 + $0x44] ss:$16 sps:$4 sm:$0xff]  }
 0x218   : > { %2515 = vmatprep.subr.bf16.mxu1 %v5290_v17  ;;  %v5372_v17 = vld [vmem:[#allocation8 + $0x48] ss:$16 sps:$4 sm:$0xff]  }
 0x21a   : > { %2387 = vmatpush1.bf16.msra.mxu0 %v5285_v16  ;;  %v5369_v16 = vld [vmem:[#allocation8 + $0x40] ss:$16 sps:$4 sm:$0xff]  }
 0x21b   : > { %2516 = vmatpush1.bf16.msra.mxu1 %v5288_v18  ;;  %2388 = vmatprep.subr.bf16.mxu0 %v5293_v20  ;;  %v5377_v18 = vld [vmem:[#allocation8 + $0x64] ss:$16 sps:$4 sm:$0xff]   ;;  %v5380_v20 = vld [vmem:[#allocation8 + $0x6c] ss:$16 sps:$4 sm:$0xff]  }
 0x21c   : > { %2517 = vmatprep.subr.bf16.mxu1 %v5296_v22  ;;  %v5378_v22 = vld [vmem:[#allocation8 + $0x68] ss:$16 sps:$4 sm:$0xff]  }
 0x21e   : > { %2389 = vmatpush1.bf16.msra.mxu0 %v5291_v21  ;;  %v5375_v21 = vld [vmem:[#allocation8 + $0x60] ss:$16 sps:$4 sm:$0xff]  }
 0x21f   : > { %2518 = vmatpush1.bf16.msra.mxu1 %v5294_v23  ;;  %2390 = vmatprep.subr.bf16.mxu0 %v5299_v24  ;;  %v5383_v23 = vld [vmem:[#allocation8 + $0x84] ss:$16 sps:$4 sm:$0xff]   ;;  %v5386_v24 = vld [vmem:[#allocation8 + $0x8c] ss:$16 sps:$4 sm:$0xff]  }
 0x220   : > { %2519 = vmatprep.subr.bf16.mxu1 %v5302_v26  ;;  %v5384_v26 = vld [vmem:[#allocation8 + $0x88] ss:$16 sps:$4 sm:$0xff]  }
 0x222   : > { %2391 = vmatpush1.bf16.msra.mxu0 %v5297_v25  ;;  %v5381_v25 = vld [vmem:[#allocation8 + $0x80] ss:$16 sps:$4 sm:$0xff]  }
 0x223   : > { %2520 = vmatpush1.bf16.msra.mxu1 %v5300_v27  ;;  %2392 = vmatprep.subr.bf16.mxu0 %v5305_v28  ;;  %v5389_v27 = vld [vmem:[#allocation8 + $0xa4] ss:$16 sps:$4 sm:$0xff]   ;;  %v5392_v28 = vld [vmem:[#allocation8 + $0xac] ss:$16 sps:$4 sm:$0xff]  }
 0x224   : > { %2521 = vmatprep.subr.bf16.mxu1 %v5308_v30  ;;  %v5390_v30 = vld [vmem:[#allocation8 + $0xa8] ss:$16 sps:$4 sm:$0xff]  }
 0x226   : > { %2393 = vmatpush1.bf16.msra.mxu0 %v5303_v29  ;;  %v5387_v29 = vld [vmem:[#allocation8 + $0xa0] ss:$16 sps:$4 sm:$0xff]  }
 0x227   : > { %2522 = vmatpush1.bf16.msra.mxu1 %v5306_v31  ;;  %2394 = vmatprep.subr.bf16.mxu0 %v5311_v32  ;;  %v5395_v31 = vld [vmem:[#allocation8 + $0xc4] ss:$16 sps:$4 sm:$0xff]   ;;  %v5398_v32 = vld [vmem:[#allocation8 + $0xcc] ss:$16 sps:$4 sm:$0xff]  }
 0x228   : > { %2523 = vmatprep.subr.bf16.mxu1 %v5314_v34  ;;  %v5396_v34 = vld [vmem:[#allocation8 + $0xc8] ss:$16 sps:$4 sm:$0xff]  }
 0x22a   : > { %2395 = vmatpush1.bf16.msra.mxu0 %v5309_v33  ;;  %v5393_v33 = vld [vmem:[#allocation8 + $0xc0] ss:$16 sps:$4 sm:$0xff]  }
 0x22b   : > { %2524 = vmatpush1.bf16.msra.mxu1 %v5312_v36  ;;  %2396 = vmatprep.subr.bf16.mxu0 %v5317_v37  ;;  %v5401_v36 = vld [vmem:[#allocation8 + $0xe4] ss:$16 sps:$4 sm:$0xff]   ;;  %v5404_v37 = vld [vmem:[#allocation8 + $0xec] ss:$16 sps:$4 sm:$0xff]  }
 0x22c   : > { %2525 = vmatprep.subr.bf16.mxu1 %v5320_v39  ;;  %v5402_v39 = vld [vmem:[#allocation8 + $0xe8] ss:$16 sps:$4 sm:$0xff]  }
 0x22e   : > { %2397 = vmatpush1.bf16.msra.mxu0 %v5315_v38  ;;  %v5399_v38 = vld [vmem:[#allocation8 + $0xe0] ss:$16 sps:$4 sm:$0xff]  }
 0x22f   : > { %2526 = vmatpush1.bf16.msra.mxu1 %v5318_v40  ;;  %2398 = vmatprep.subr.bf16.mxu0 %v5323_v42  ;;  %v5407_v40 = vld [vmem:[#allocation8 + $0x104] ss:$16 sps:$4 sm:$0xff]   ;;  %v5410_v42 = vld [vmem:[#allocation8 + $0x10c] ss:$16 sps:$4 sm:$0xff]  }
 0x230   : > { %2527 = vmatprep.subr.bf16.mxu1 %v5326_v44  ;;  %v5408_v44 = vld [vmem:[#allocation8 + $0x108] ss:$16 sps:$4 sm:$0xff]  }
 0x232   : > { %2399 = vmatpush1.bf16.msra.mxu0 %v5321_v43  ;;  %v5405_v43 = vld [vmem:[#allocation8 + $0x100] ss:$16 sps:$4 sm:$0xff]  }
 0x233   : > { %2528 = vmatpush1.bf16.msra.mxu1 %v5324_v45  ;;  %2400 = vmatprep.subr.bf16.mxu0 %v5329_v46  ;;  %v5413_v45 = vld [vmem:[#allocation8 + $0x124] ss:$16 sps:$4 sm:$0xff]   ;;  %v5416_v46 = vld [vmem:[#allocation8 + $0x12c] ss:$16 sps:$4 sm:$0xff]  }
 0x234   : > { %2529 = vmatprep.subr.bf16.mxu1 %v5332_v48  ;;  %v5414_v48 = vld [vmem:[#allocation8 + $0x128] ss:$16 sps:$4 sm:$0xff]  }
 0x236   : > { %2401 = vmatpush1.bf16.msra.mxu0 %v5327_v47  ;;  %v5411_v47 = vld [vmem:[#allocation8 + $0x120] ss:$16 sps:$4 sm:$0xff]  }
 0x237   : > { %2530 = vmatpush1.bf16.msra.mxu1 %v5330_v49  ;;  %2402 = vmatprep.subr.bf16.mxu0 %v5335_v50  ;;  %v5419_v49 = vld [vmem:[#allocation8 + $0x144] ss:$16 sps:$4 sm:$0xff]   ;;  %v5422_v50 = vld [vmem:[#allocation8 + $0x14c] ss:$16 sps:$4 sm:$0xff]  }
 0x238   : > { %2531 = vmatprep.subr.bf16.mxu1 %v5338_v52  ;;  %v5420_v52 = vld [vmem:[#allocation8 + $0x148] ss:$16 sps:$4 sm:$0xff]  }
 0x23a   : > { %2403 = vmatpush1.bf16.msra.mxu0 %v5333_v51  ;;  %v5417_v51 = vld [vmem:[#allocation8 + $0x140] ss:$16 sps:$4 sm:$0xff]  }
 0x23b   : > { %2532 = vmatpush1.bf16.msra.mxu1 %v5336_v53  ;;  %2404 = vmatprep.subr.bf16.mxu0 %v5341_v54  ;;  %v5425_v53 = vld [vmem:[#allocation8 + $0x164] ss:$16 sps:$4 sm:$0xff]   ;;  %v5428_v54 = vld [vmem:[#allocation8 + $0x16c] ss:$16 sps:$4 sm:$0xff]  }
 0x23c   : > { %2533 = vmatprep.subr.bf16.mxu1 %v5344_v56  ;;  %v5426_v56 = vld [vmem:[#allocation8 + $0x168] ss:$16 sps:$4 sm:$0xff]  }
 0x23e   : > { %2405 = vmatpush1.bf16.msra.mxu0 %v5339_v55  ;;  %v5423_v55 = vld [vmem:[#allocation8 + $0x160] ss:$16 sps:$4 sm:$0xff]  }
 0x23f   : > { %2534 = vmatpush1.bf16.msra.mxu1 %v5342_v57  ;;  %2406 = vmatprep.subr.bf16.mxu0 %v5347_v58  ;;  %v5431_v57 = vld [vmem:[#allocation8 + $0x184] ss:$16 sps:$4 sm:$0xff]   ;;  %v5434_v58 = vld [vmem:[#allocation8 + $0x18c] ss:$16 sps:$4 sm:$0xff]  }
 0x240   : > { %2535 = vmatprep.subr.bf16.mxu1 %v5350_v60  ;;  %v5432_v60 = vld [vmem:[#allocation8 + $0x188] ss:$16 sps:$4 sm:$0xff]  }
 0x242   : > { %2407 = vmatpush1.bf16.msra.mxu0 %v5345_v59  ;;  %v5429_v59 = vld [vmem:[#allocation8 + $0x180] ss:$16 sps:$4 sm:$0xff]  }
 0x243   : > { %2536 = vmatpush1.bf16.msra.mxu1 %v5348_v61  ;;  %2408 = vmatprep.subr.bf16.mxu0 %v5353_v62  ;;  %v5437_v61 = vld [vmem:[#allocation8 + $0x1a4] ss:$16 sps:$4 sm:$0xff]   ;;  %v5440_v62 = vld [vmem:[#allocation8 + $0x1ac] ss:$16 sps:$4 sm:$0xff]  }
 0x244   : > { %2537 = vmatprep.subr.bf16.mxu1 %v5356_v1  ;;  %v5443_v1 = vld [vmem:[#allocation8 + $0x1c4] ss:$16 sps:$4 sm:$0xff]  }
 0x246   : > { %2409 = vmatpush1.bf16.msra.mxu0 %v5351_v0  ;;  %v5438_v0 = vld [vmem:[#allocation8 + $0x1a8] ss:$16 sps:$4 sm:$0xff]  }
 0x247   : > { %2538 = vmatpush1.bf16.msra.mxu1 %v5354_v3  ;;  %3540 = vmatprep.subr.bf16.mxu0 %v5359_v5  ;;  %v5441_v3 = vld [vmem:[#allocation8 + $0x1c0] ss:$16 sps:$4 sm:$0xff]   ;;  %v5449_v5 = vld [vmem:[#allocation8 + $0x1e4] ss:$16 sps:$4 sm:$0xff]  }
 0x248   : > { %3669 = vmatprep.subr.bf16.mxu1 %v5362_v6  ;;  %v5452_v6 = vld [vmem:[#allocation8 + $0x1ec] ss:$16 sps:$4 sm:$0xff]  }
 0x249   : > { %2411 = vmatmul.mubr.bf16.vlgmr.msra.gmra.mrb[0].mxu0 %v1138_v9 }
 0x24a   : > { %2540 = vmatmul.mubr.bf16.vlgmr.msra.gmra.mrb[0].mxu1 %v1138_v9  ;;  %3541 = vmatpush1.bf16.msra.mxu0 %v5357_v8  ;;  %v5450_v8 = vld [vmem:[#allocation8 + $0x1e8] ss:$16 sps:$4 sm:$0xff]   ;;  %v5458_v9 = vld [vmem:[#allocation8 + $0x204] ss:$16 sps:$4 sm:$0xff]  }
 0x24b   : > { %3670 = vmatpush1.bf16.msra.mxu1 %v5360_v10  ;;  %3542 = vmatprep.subr.bf16.mxu0 %v5365_v11  ;;  %v5461_v10 = vld [vmem:[#allocation8 + $0x20c] ss:$16 sps:$4 sm:$0xff]   ;;  %v5453_v11 = vld [vmem:[#allocation6] ss:$24 sps:$4 sm:$0xff]  }
 0x24c   : > { %3671 = vmatprep.subr.bf16.mxu1 %v5368_v12  ;;  %3572 = vmatprep.mubr.bf16.mxu0 %v5455_v13  ;;  %v5456_v12 = vld [vmem:[#allocation8 + $0x200] ss:$16 sps:$4 sm:$0xff]  }
 0x24d   : > { %3701 = vmatprep.mubr.bf16.mxu1 %v5455_v13  ;;  %v5459_v13 = vld [vmem:[#allocation8 + $0x208] ss:$16 sps:$4 sm:$0xff]  }
 0x24e   : > { %3543 = vmatpush1.bf16.msra.mxu0 %v5363_v14  ;;  %v5464_v14 = vld [vmem:[#allocation8 + $0x224] ss:$16 sps:$4 sm:$0xff]  }
 0x24f   : > { %3672 = vmatpush1.bf16.msra.mxu1 %v5366_v41  ;;  %3544 = vmatprep.subr.bf16.mxu0 %v5371_v15  ;;  %v5467_v41 = vld [vmem:[#allocation8 + $0x22c] ss:$16 sps:$4 sm:$0xff]  }
 0x250   : > { %3673 = vmatprep.subr.bf16.mxu1 %v5374_v35  ;;  %v5554_v15 = vld [vmem:[#allocation6 + $0xc] ss:$24 sps:$4 sm:$0xff]   ;;  %v5462_v35 = vld [vmem:[#allocation8 + $0x220] ss:$16 sps:$4 sm:$0xff]  }
 0x252   : > { %3545 = vmatpush1.bf16.msra.mxu0 %v5369_v16  ;;  %v5465_v16 = vld [vmem:[#allocation8 + $0x228] ss:$16 sps:$4 sm:$0xff]  }
 0x253   : > { %3674 = vmatpush1.bf16.msra.mxu1 %v5372_v17  ;;  %3546 = vmatprep.subr.bf16.mxu0 %v5377_v18  ;;  %v5470_v17 = vld [vmem:[#allocation8 + $0x244] ss:$16 sps:$4 sm:$0xff]   ;;  %v5473_v18 = vld [vmem:[#allocation8 + $0x24c] ss:$16 sps:$4 sm:$0xff]  }
 0x254   : > { %3675 = vmatprep.subr.bf16.mxu1 %v5380_v20  ;;  %v5468_v20 = vld [vmem:[#allocation8 + $0x240] ss:$16 sps:$4 sm:$0xff]  }
 0x256   : > { %3547 = vmatpush1.bf16.msra.mxu0 %v5375_v21  ;;  %v5471_v21 = vld [vmem:[#allocation8 + $0x248] ss:$16 sps:$4 sm:$0xff]  }
 0x257   : > { %3676 = vmatpush1.bf16.msra.mxu1 %v5378_v22  ;;  %3548 = vmatprep.subr.bf16.mxu0 %v5383_v23  ;;  %v5476_v22 = vld [vmem:[#allocation8 + $0x264] ss:$16 sps:$4 sm:$0xff]   ;;  %v5479_v23 = vld [vmem:[#allocation8 + $0x26c] ss:$16 sps:$4 sm:$0xff]  }
 0x258   : > { %3677 = vmatprep.subr.bf16.mxu1 %v5386_v24  ;;  %v5474_v24 = vld [vmem:[#allocation8 + $0x260] ss:$16 sps:$4 sm:$0xff]  }
 0x25a   : > { %3549 = vmatpush1.bf16.msra.mxu0 %v5381_v25  ;;  %v5477_v25 = vld [vmem:[#allocation8 + $0x268] ss:$16 sps:$4 sm:$0xff]  }
 0x25b   : > { %3678 = vmatpush1.bf16.msra.mxu1 %v5384_v26  ;;  %3550 = vmatprep.subr.bf16.mxu0 %v5389_v27  ;;  %v5482_v26 = vld [vmem:[#allocation8 + $0x284] ss:$16 sps:$4 sm:$0xff]   ;;  %v5485_v27 = vld [vmem:[#allocation8 + $0x28c] ss:$16 sps:$4 sm:$0xff]  }
 0x25c   : > { %3679 = vmatprep.subr.bf16.mxu1 %v5392_v28  ;;  %v5480_v28 = vld [vmem:[#allocation8 + $0x280] ss:$16 sps:$4 sm:$0xff]  }
 0x25e   : > { %3551 = vmatpush1.bf16.msra.mxu0 %v5387_v29  ;;  %v5483_v29 = vld [vmem:[#allocation8 + $0x288] ss:$16 sps:$4 sm:$0xff]  }
 0x25f   : > { %3680 = vmatpush1.bf16.msra.mxu1 %v5390_v30  ;;  %3552 = vmatprep.subr.bf16.mxu0 %v5395_v31  ;;  %v5488_v30 = vld [vmem:[#allocation8 + $0x2a4] ss:$16 sps:$4 sm:$0xff]   ;;  %v5491_v31 = vld [vmem:[#allocation8 + $0x2ac] ss:$16 sps:$4 sm:$0xff]  }
 0x260   : > { %3681 = vmatprep.subr.bf16.mxu1 %v5398_v32  ;;  %v5486_v32 = vld [vmem:[#allocation8 + $0x2a0] ss:$16 sps:$4 sm:$0xff]  }
 0x262   : > { %3553 = vmatpush1.bf16.msra.mxu0 %v5393_v33  ;;  %v5489_v33 = vld [vmem:[#allocation8 + $0x2a8] ss:$16 sps:$4 sm:$0xff]  }
 0x263   : > { %3682 = vmatpush1.bf16.msra.mxu1 %v5396_v34  ;;  %3554 = vmatprep.subr.bf16.mxu0 %v5401_v36  ;;  %v5494_v34 = vld [vmem:[#allocation8 + $0x2c4] ss:$16 sps:$4 sm:$0xff]   ;;  %v5497_v36 = vld [vmem:[#allocation8 + $0x2cc] ss:$16 sps:$4 sm:$0xff]  }
 0x264   : > { %3683 = vmatprep.subr.bf16.mxu1 %v5404_v37  ;;  %v5492_v37 = vld [vmem:[#allocation8 + $0x2c0] ss:$16 sps:$4 sm:$0xff]  }
 0x266   : > { %3555 = vmatpush1.bf16.msra.mxu0 %v5399_v38  ;;  %v5495_v38 = vld [vmem:[#allocation8 + $0x2c8] ss:$16 sps:$4 sm:$0xff]  }
 0x267   : > { %3684 = vmatpush1.bf16.msra.mxu1 %v5402_v39  ;;  %3556 = vmatprep.subr.bf16.mxu0 %v5407_v40  ;;  %v5500_v39 = vld [vmem:[#allocation8 + $0x2e4] ss:$16 sps:$4 sm:$0xff]   ;;  %v5503_v40 = vld [vmem:[#allocation8 + $0x2ec] ss:$16 sps:$4 sm:$0xff]  }
 0x268   : > { %3685 = vmatprep.subr.bf16.mxu1 %v5410_v42  ;;  %v5498_v42 = vld [vmem:[#allocation8 + $0x2e0] ss:$16 sps:$4 sm:$0xff]  }
 0x26a   : > { %3557 = vmatpush1.bf16.msra.mxu0 %v5405_v43  ;;  %v5501_v43 = vld [vmem:[#allocation8 + $0x2e8] ss:$16 sps:$4 sm:$0xff]  }
 0x26b   : > { %3686 = vmatpush1.bf16.msra.mxu1 %v5408_v44  ;;  %3558 = vmatprep.subr.bf16.mxu0 %v5413_v45  ;;  %v5506_v44 = vld [vmem:[#allocation8 + $0x304] ss:$16 sps:$4 sm:$0xff]   ;;  %v5509_v45 = vld [vmem:[#allocation8 + $0x30c] ss:$16 sps:$4 sm:$0xff]  }
 0x26c   : > { %3687 = vmatprep.subr.bf16.mxu1 %v5416_v46  ;;  %v5504_v46 = vld [vmem:[#allocation8 + $0x300] ss:$16 sps:$4 sm:$0xff]  }
 0x26e   : > { %3559 = vmatpush1.bf16.msra.mxu0 %v5411_v47  ;;  %v5507_v47 = vld [vmem:[#allocation8 + $0x308] ss:$16 sps:$4 sm:$0xff]  }
 0x26f   : > { %3688 = vmatpush1.bf16.msra.mxu1 %v5414_v48  ;;  %3560 = vmatprep.subr.bf16.mxu0 %v5419_v49  ;;  %v5512_v48 = vld [vmem:[#allocation8 + $0x324] ss:$16 sps:$4 sm:$0xff]   ;;  %v5515_v49 = vld [vmem:[#allocation8 + $0x32c] ss:$16 sps:$4 sm:$0xff]  }
 0x270   : > { %3689 = vmatprep.subr.bf16.mxu1 %v5422_v50  ;;  %v5510_v50 = vld [vmem:[#allocation8 + $0x320] ss:$16 sps:$4 sm:$0xff]  }
 0x272   : > { %3561 = vmatpush1.bf16.msra.mxu0 %v5417_v51  ;;  %v5513_v51 = vld [vmem:[#allocation8 + $0x328] ss:$16 sps:$4 sm:$0xff]  }
 0x273   : > { %3690 = vmatpush1.bf16.msra.mxu1 %v5420_v52  ;;  %3562 = vmatprep.subr.bf16.mxu0 %v5425_v53  ;;  %v5518_v52 = vld [vmem:[#allocation8 + $0x344] ss:$16 sps:$4 sm:$0xff]   ;;  %v5521_v53 = vld [vmem:[#allocation8 + $0x34c] ss:$16 sps:$4 sm:$0xff]  }
 0x274   : > { %3691 = vmatprep.subr.bf16.mxu1 %v5428_v54  ;;  %v5516_v54 = vld [vmem:[#allocation8 + $0x340] ss:$16 sps:$4 sm:$0xff]  }
 0x276   : > { %3563 = vmatpush1.bf16.msra.mxu0 %v5423_v55  ;;  %v5519_v55 = vld [vmem:[#allocation8 + $0x348] ss:$16 sps:$4 sm:$0xff]  }
 0x277   : > { %3692 = vmatpush1.bf16.msra.mxu1 %v5426_v56  ;;  %3564 = vmatprep.subr.bf16.mxu0 %v5431_v57  ;;  %v5524_v56 = vld [vmem:[#allocation8 + $0x364] ss:$16 sps:$4 sm:$0xff]   ;;  %v5527_v57 = vld [vmem:[#allocation8 + $0x36c] ss:$16 sps:$4 sm:$0xff]  }
 0x278   : > { %3693 = vmatprep.subr.bf16.mxu1 %v5434_v58  ;;  %v5522_v58 = vld [vmem:[#allocation8 + $0x360] ss:$16 sps:$4 sm:$0xff]  }
 0x27a   : > { %3565 = vmatpush1.bf16.msra.mxu0 %v5429_v59  ;;  %v5525_v59 = vld [vmem:[#allocation8 + $0x368] ss:$16 sps:$4 sm:$0xff]  }
 0x27b   : > { %3694 = vmatpush1.bf16.msra.mxu1 %v5432_v60  ;;  %3566 = vmatprep.subr.bf16.mxu0 %v5437_v61  ;;  %v5530_v60 = vld [vmem:[#allocation8 + $0x384] ss:$16 sps:$4 sm:$0xff]   ;;  %v5533_v61 = vld [vmem:[#allocation8 + $0x38c] ss:$16 sps:$4 sm:$0xff]  }
 0x27c   : > { %3695 = vmatprep.subr.bf16.mxu1 %v5440_v62  ;;  %v5528_v62 = vld [vmem:[#allocation8 + $0x380] ss:$16 sps:$4 sm:$0xff]  }
 0x27e   : > { %3567 = vmatpush1.bf16.msra.mxu0 %v5435_v63  ;;  %v5531_v63 = vld [vmem:[#allocation8 + $0x388] ss:$16 sps:$4 sm:$0xff]  }
 0x27f   : > { %3696 = vmatpush1.bf16.msra.mxu1 %v5438_v0  ;;  %3568 = vmatprep.subr.bf16.mxu0 %v5443_v1  ;;  %v5536_v0 = vld [vmem:[#allocation8 + $0x3a4] ss:$16 sps:$4 sm:$0xff]   ;;  %v5539_v1 = vld [vmem:[#allocation8 + $0x3ac] ss:$16 sps:$4 sm:$0xff]  }
 0x280   : > { %3697 = vmatprep.subr.bf16.mxu1 %v5446_v2  ;;  %v5534_v2 = vld [vmem:[#allocation8 + $0x3a0] ss:$16 sps:$4 sm:$0xff]  }
 0x282   : > { %3569 = vmatpush1.bf16.msra.mxu0 %v5441_v3  ;;  %v5537_v3 = vld [vmem:[#allocation8 + $0x3a8] ss:$16 sps:$4 sm:$0xff]  }
 0x283   : > { %3698 = vmatpush1.bf16.msra.mxu1 %v5444_v4  ;;  %3570 = vmatprep.subr.bf16.mxu0 %v5449_v5  ;;  %v5542_v4 = vld [vmem:[#allocation8 + $0x3c4] ss:$16 sps:$4 sm:$0xff]   ;;  %v5545_v5 = vld [vmem:[#allocation8 + $0x3cc] ss:$16 sps:$4 sm:$0xff]  }
 0x284   : > { %3699 = vmatprep.subr.bf16.mxu1 %v5452_v6  ;;  %v5540_v6 = vld [vmem:[#allocation8 + $0x3c0] ss:$16 sps:$4 sm:$0xff]  }
 0x286   : > { %3571 = vmatpush1.bf16.msra.mxu0 %v5447_v7  ;;  %v5543_v7 = vld [vmem:[#allocation8 + $0x3c8] ss:$16 sps:$4 sm:$0xff]  }
 0x287   : > { %3700 = vmatpush1.bf16.msra.mxu1 %v5450_v8  ;;  %3583 = vmatprep.subr.bf16.mxu0 %v5458_v9  ;;  %v5548_v8 = vld [vmem:[#allocation8 + $0x3e4] ss:$16 sps:$4 sm:$0xff]   ;;  %v5551_v9 = vld [vmem:[#allocation8 + $0x3ec] ss:$16 sps:$4 sm:$0xff]  }
 0x288   : > { %3712 = vmatprep.subr.bf16.mxu1 %v5461_v10  ;;  %v5546_v10 = vld [vmem:[#allocation8 + $0x3e0] ss:$16 sps:$4 sm:$0xff]  }
 0x289   : > { %3573 = vmatmul.mubr.bf16.vlgmr.msra.gmra.mrb[0].mxu0 %v5453_v11 }
 0x28a   : > { %3584 = vmatpush1.bf16.msra.mxu0 %v5456_v12  ;;  %3702 = vmatmul.mubr.bf16.vlgmr.msra.gmra.mrb[0].mxu1 %v5453_v11  ;;  %v5549_v11 = vld [vmem:[#allocation8 + $0x3e8] ss:$16 sps:$4 sm:$0xff]   ;;  %v5557_v12 = vld [vmem:[#allocation8 + $0x404] ss:$16 sps:$4 sm:$0xff]  }
 0x28b   : > { %3713 = vmatpush1.bf16.msra.mxu1 %v5459_v13  ;;  %3585 = vmatprep.subr.bf16.mxu0 %v5464_v14  ;;  %v5560_v13 = vld [vmem:[#allocation8 + $0x40c] ss:$16 sps:$4 sm:$0xff]   ;;  %v5552_v14 = vld [vmem:[#allocation6 + $0x8] ss:$24 sps:$4 sm:$0xff]  }
 0x28c   : > { %3714 = vmatprep.subr.bf16.mxu1 %v5467_v41  ;;  %3615 = vmatprep.mubr.bf16.mxu0 %v5554_v15  ;;  %v5555_v41 = vld [vmem:[#allocation8 + $0x400] ss:$16 sps:$4 sm:$0xff]  }
 0x28d   : > { %3744 = vmatprep.mubr.bf16.mxu1 %v5554_v15  ;;  %v5558_v15 = vld [vmem:[#allocation8 + $0x408] ss:$16 sps:$4 sm:$0xff]  }
 0x28e   : > { %3586 = vmatpush1.bf16.msra.mxu0 %v5462_v35  ;;  %v5563_v35 = vld [vmem:[#allocation8 + $0x424] ss:$16 sps:$4 sm:$0xff]  }
 0x28f   : > { %3715 = vmatpush1.bf16.msra.mxu1 %v5465_v16  ;;  %3587 = vmatprep.subr.bf16.mxu0 %v5470_v17  ;;  %v5566_v16 = vld [vmem:[#allocation8 + $0x42c] ss:$16 sps:$4 sm:$0xff]  }
 0x290   : > { %3716 = vmatprep.subr.bf16.mxu1 %v5473_v18  ;;  %v5653_v17 = vld [vmem:[#allocation6 + $0x14] ss:$24 sps:$4 sm:$0xff]   ;;  %v5561_v18 = vld [vmem:[#allocation8 + $0x420] ss:$16 sps:$4 sm:$0xff]  }
 0x292   : > { %3588 = vmatpush1.bf16.msra.mxu0 %v5468_v20  ;;  %v5564_v20 = vld [vmem:[#allocation8 + $0x428] ss:$16 sps:$4 sm:$0xff]  }
 0x293   : > { %3717 = vmatpush1.bf16.msra.mxu1 %v5471_v21  ;;  %3589 = vmatprep.subr.bf16.mxu0 %v5476_v22  ;;  %v5569_v21 = vld [vmem:[#allocation8 + $0x444] ss:$16 sps:$4 sm:$0xff]   ;;  %v5572_v22 = vld [vmem:[#allocation8 + $0x44c] ss:$16 sps:$4 sm:$0xff]  }
 0x294   : > { %3718 = vmatprep.subr.bf16.mxu1 %v5479_v23  ;;  %v5567_v23 = vld [vmem:[#allocation8 + $0x440] ss:$16 sps:$4 sm:$0xff]  }
 0x296   : > { %3590 = vmatpush1.bf16.msra.mxu0 %v5474_v24  ;;  %v5570_v24 = vld [vmem:[#allocation8 + $0x448] ss:$16 sps:$4 sm:$0xff]  }
 0x297   : > { %3719 = vmatpush1.bf16.msra.mxu1 %v5477_v25  ;;  %3591 = vmatprep.subr.bf16.mxu0 %v5482_v26  ;;  %v5575_v25 = vld [vmem:[#allocation8 + $0x464] ss:$16 sps:$4 sm:$0xff]   ;;  %v5578_v26 = vld [vmem:[#allocation8 + $0x46c] ss:$16 sps:$4 sm:$0xff]  }
 0x298   : > { %3720 = vmatprep.subr.bf16.mxu1 %v5485_v27  ;;  %v5573_v27 = vld [vmem:[#allocation8 + $0x460] ss:$16 sps:$4 sm:$0xff]  }
 0x29a   : > { %3592 = vmatpush1.bf16.msra.mxu0 %v5480_v28  ;;  %v5576_v28 = vld [vmem:[#allocation8 + $0x468] ss:$16 sps:$4 sm:$0xff]  }
 0x29b   : > { %3721 = vmatpush1.bf16.msra.mxu1 %v5483_v29  ;;  %3593 = vmatprep.subr.bf16.mxu0 %v5488_v30  ;;  %v5581_v29 = vld [vmem:[#allocation8 + $0x484] ss:$16 sps:$4 sm:$0xff]   ;;  %v5584_v30 = vld [vmem:[#allocation8 + $0x48c] ss:$16 sps:$4 sm:$0xff]  }
 0x29c   : > { %3722 = vmatprep.subr.bf16.mxu1 %v5491_v31  ;;  %v5579_v31 = vld [vmem:[#allocation8 + $0x480] ss:$16 sps:$4 sm:$0xff]  }
 0x29e   : > { %3594 = vmatpush1.bf16.msra.mxu0 %v5486_v32  ;;  %v5582_v32 = vld [vmem:[#allocation8 + $0x488] ss:$16 sps:$4 sm:$0xff]  }
 0x29f   : > { %3723 = vmatpush1.bf16.msra.mxu1 %v5489_v33  ;;  %3595 = vmatprep.subr.bf16.mxu0 %v5494_v34  ;;  %v5587_v33 = vld [vmem:[#allocation8 + $0x4a4] ss:$16 sps:$4 sm:$0xff]   ;;  %v5590_v34 = vld [vmem:[#allocation8 + $0x4ac] ss:$16 sps:$4 sm:$0xff]  }
 0x2a0   : > { %3724 = vmatprep.subr.bf16.mxu1 %v5497_v36  ;;  %v5585_v36 = vld [vmem:[#allocation8 + $0x4a0] ss:$16 sps:$4 sm:$0xff]  }
 0x2a2   : > { %3596 = vmatpush1.bf16.msra.mxu0 %v5492_v37  ;;  %v5588_v37 = vld [vmem:[#allocation8 + $0x4a8] ss:$16 sps:$4 sm:$0xff]  }
 0x2a3   : > { %3725 = vmatpush1.bf16.msra.mxu1 %v5495_v38  ;;  %3597 = vmatprep.subr.bf16.mxu0 %v5500_v39  ;;  %v5593_v38 = vld [vmem:[#allocation8 + $0x4c4] ss:$16 sps:$4 sm:$0xff]   ;;  %v5596_v39 = vld [vmem:[#allocation8 + $0x4cc] ss:$16 sps:$4 sm:$0xff]  }
 0x2a4   : > { %3726 = vmatprep.subr.bf16.mxu1 %v5503_v40  ;;  %v5591_v40 = vld [vmem:[#allocation8 + $0x4c0] ss:$16 sps:$4 sm:$0xff]  }
 0x2a6   : > { %3598 = vmatpush1.bf16.msra.mxu0 %v5498_v42  ;;  %v5594_v42 = vld [vmem:[#allocation8 + $0x4c8] ss:$16 sps:$4 sm:$0xff]  }
 0x2a7   : > { %3727 = vmatpush1.bf16.msra.mxu1 %v5501_v43  ;;  %3599 = vmatprep.subr.bf16.mxu0 %v5506_v44  ;;  %v5599_v43 = vld [vmem:[#allocation8 + $0x4e4] ss:$16 sps:$4 sm:$0xff]   ;;  %v5602_v44 = vld [vmem:[#allocation8 + $0x4ec] ss:$16 sps:$4 sm:$0xff]  }
 0x2a8   : > { %3728 = vmatprep.subr.bf16.mxu1 %v5509_v45  ;;  %v5597_v45 = vld [vmem:[#allocation8 + $0x4e0] ss:$16 sps:$4 sm:$0xff]  }
 0x2aa   : > { %3600 = vmatpush1.bf16.msra.mxu0 %v5504_v46  ;;  %v5600_v46 = vld [vmem:[#allocation8 + $0x4e8] ss:$16 sps:$4 sm:$0xff]  }
 0x2ab   : > { %3729 = vmatpush1.bf16.msra.mxu1 %v5507_v47  ;;  %3601 = vmatprep.subr.bf16.mxu0 %v5512_v48  ;;  %v5605_v47 = vld [vmem:[#allocation8 + $0x504] ss:$16 sps:$4 sm:$0xff]   ;;  %v5608_v48 = vld [vmem:[#allocation8 + $0x50c] ss:$16 sps:$4 sm:$0xff]  }
 0x2ac   : > { %3730 = vmatprep.subr.bf16.mxu1 %v5515_v49  ;;  %v5603_v49 = vld [vmem:[#allocation8 + $0x500] ss:$16 sps:$4 sm:$0xff]  }
 0x2ae   : > { %3602 = vmatpush1.bf16.msra.mxu0 %v5510_v50  ;;  %v5606_v50 = vld [vmem:[#allocation8 + $0x508] ss:$16 sps:$4 sm:$0xff]  }
 0x2af   : > { %3731 = vmatpush1.bf16.msra.mxu1 %v5513_v51  ;;  %3603 = vmatprep.subr.bf16.mxu0 %v5518_v52  ;;  %v5611_v51 = vld [vmem:[#allocation8 + $0x524] ss:$16 sps:$4 sm:$0xff]   ;;  %v5614_v52 = vld [vmem:[#allocation8 + $0x52c] ss:$16 sps:$4 sm:$0xff]  }
 0x2b0   : > { %3732 = vmatprep.subr.bf16.mxu1 %v5521_v53  ;;  %v5609_v53 = vld [vmem:[#allocation8 + $0x520] ss:$16 sps:$4 sm:$0xff]  }
 0x2b2   : > { %3604 = vmatpush1.bf16.msra.mxu0 %v5516_v54  ;;  %v5612_v54 = vld [vmem:[#allocation8 + $0x528] ss:$16 sps:$4 sm:$0xff]  }
 0x2b3   : > { %3733 = vmatpush1.bf16.msra.mxu1 %v5519_v55  ;;  %3605 = vmatprep.subr.bf16.mxu0 %v5524_v56  ;;  %v5617_v55 = vld [vmem:[#allocation8 + $0x544] ss:$16 sps:$4 sm:$0xff]   ;;  %v5620_v56 = vld [vmem:[#allocation8 + $0x54c] ss:$16 sps:$4 sm:$0xff]  }
 0x2b4   : > { %3734 = vmatprep.subr.bf16.mxu1 %v5527_v57  ;;  %v5615_v57 = vld [vmem:[#allocation8 + $0x540] ss:$16 sps:$4 sm:$0xff]  }
 0x2b6   : > { %3606 = vmatpush1.bf16.msra.mxu0 %v5522_v58  ;;  %v5618_v58 = vld [vmem:[#allocation8 + $0x548] ss:$16 sps:$4 sm:$0xff]  }
 0x2b7   : > { %3735 = vmatpush1.bf16.msra.mxu1 %v5525_v59  ;;  %3607 = vmatprep.subr.bf16.mxu0 %v5530_v60  ;;  %v5623_v59 = vld [vmem:[#allocation8 + $0x564] ss:$16 sps:$4 sm:$0xff]   ;;  %v5626_v60 = vld [vmem:[#allocation8 + $0x56c] ss:$16 sps:$4 sm:$0xff]  }
 0x2b8   : > { %3736 = vmatprep.subr.bf16.mxu1 %v5533_v61  ;;  %v5621_v61 = vld [vmem:[#allocation8 + $0x560] ss:$16 sps:$4 sm:$0xff]  }
 0x2ba   : > { %3608 = vmatpush1.bf16.msra.mxu0 %v5528_v62  ;;  %v5624_v62 = vld [vmem:[#allocation8 + $0x568] ss:$16 sps:$4 sm:$0xff]  }
 0x2bb   : > { %3737 = vmatpush1.bf16.msra.mxu1 %v5531_v63  ;;  %3609 = vmatprep.subr.bf16.mxu0 %v5536_v0  ;;  %v5629_v63 = vld [vmem:[#allocation8 + $0x584] ss:$16 sps:$4 sm:$0xff]   ;;  %v5632_v0 = vld [vmem:[#allocation8 + $0x58c] ss:$16 sps:$4 sm:$0xff]  }
 0x2bc   : > { %3738 = vmatprep.subr.bf16.mxu1 %v5539_v1  ;;  %v5627_v1 = vld [vmem:[#allocation8 + $0x580] ss:$16 sps:$4 sm:$0xff]  }
 0x2be   : > { %3610 = vmatpush1.bf16.msra.mxu0 %v5534_v2  ;;  %v5630_v2 = vld [vmem:[#allocation8 + $0x588] ss:$16 sps:$4 sm:$0xff]  }
 0x2bf   : > { %3739 = vmatpush1.bf16.msra.mxu1 %v5537_v3  ;;  %3611 = vmatprep.subr.bf16.mxu0 %v5542_v4  ;;  %v5635_v3 = vld [vmem:[#allocation8 + $0x5a4] ss:$16 sps:$4 sm:$0xff]   ;;  %v5638_v4 = vld [vmem:[#allocation8 + $0x5ac] ss:$16 sps:$4 sm:$0xff]  }
 0x2c0   : > { %3740 = vmatprep.subr.bf16.mxu1 %v5545_v5  ;;  %v5633_v5 = vld [vmem:[#allocation8 + $0x5a0] ss:$16 sps:$4 sm:$0xff]  }
 0x2c2   : > { %3612 = vmatpush1.bf16.msra.mxu0 %v5540_v6  ;;  %v5636_v6 = vld [vmem:[#allocation8 + $0x5a8] ss:$16 sps:$4 sm:$0xff]  }
 0x2c3   : > { %3741 = vmatpush1.bf16.msra.mxu1 %v5543_v7  ;;  %3613 = vmatprep.subr.bf16.mxu0 %v5548_v8  ;;  %v5641_v7 = vld [vmem:[#allocation8 + $0x5c4] ss:$16 sps:$4 sm:$0xff]   ;;  %v5644_v8 = vld [vmem:[#allocation8 + $0x5cc] ss:$16 sps:$4 sm:$0xff]  }
 0x2c4   : > { %3742 = vmatprep.subr.bf16.mxu1 %v5551_v9  ;;  %v5639_v9 = vld [vmem:[#allocation8 + $0x5c0] ss:$16 sps:$4 sm:$0xff]  }
 0x2c6   : > { %3614 = vmatpush1.bf16.msra.mxu0 %v5546_v10  ;;  %v5642_v10 = vld [vmem:[#allocation8 + $0x5c8] ss:$16 sps:$4 sm:$0xff]  }
 0x2c7   : > { %3743 = vmatpush1.bf16.msra.mxu1 %v5549_v11  ;;  %3626 = vmatprep.subr.bf16.mxu0 %v5557_v12  ;;  %v5647_v11 = vld [vmem:[#allocation8 + $0x5e4] ss:$16 sps:$4 sm:$0xff]   ;;  %v5650_v12 = vld [vmem:[#allocation8 + $0x5ec] ss:$16 sps:$4 sm:$0xff]  }
 0x2c8   : > { %3755 = vmatprep.subr.bf16.mxu1 %v5560_v13  ;;  %v5645_v13 = vld [vmem:[#allocation8 + $0x5e0] ss:$16 sps:$4 sm:$0xff]  }
 0x2c9   : > { %3616 = vmatmul.mubr.bf16.vlgmr.msra.gmra.mrb[0].mxu0 %v5552_v14 }
 0x2ca   : > { %3627 = vmatpush1.bf16.msra.mxu0 %v5555_v41  ;;  %3745 = vmatmul.mubr.bf16.vlgmr.msra.gmra.mrb[0].mxu1 %v5552_v14  ;;  %v5648_v14 = vld [vmem:[#allocation8 + $0x5e8] ss:$16 sps:$4 sm:$0xff]   ;;  %v5654_v41 = vld [vmem:[#allocation11 + $0x40] sm:$0xff]  }
 0x2cb   : > { %3756 = vmatpush1.bf16.msra.mxu1 %v5558_v15  ;;  %3628 = vmatprep.subr.bf16.mxu0 %v5563_v35  ;;  %v5655_v15 = vld [vmem:[#allocation11 + $0xc0] sm:$0xff]  }
 0x2cc   : > { %3757 = vmatprep.subr.bf16.mxu1 %v5566_v16  ;;  %3658 = vmatprep.mubr.bf16.mxu0 %v5653_v17  ;;  %v5651_v35 = vld [vmem:[#allocation6 + $0x10] ss:$24 sps:$4 sm:$0xff]  }
 0x2cd   : > { %3787 = vmatprep.mubr.bf16.mxu1 %v5653_v17  ;;  %v5656_v16 = vld [vmem:[#allocation11] sm:$0xff]  }
 0x2ce   : > { %3629 = vmatpush1.bf16.msra.mxu0 %v5561_v18  ;;  %v5657_v17 = vld [vmem:[#allocation11 + $0x80] sm:$0xff]   ;;  %v5658_v18 = vld [vmem:[#allocation11 + $0x48] sm:$0xff]  }
 0x2cf   : > { %3758 = vmatpush1.bf16.msra.mxu1 %v5564_v20  ;;  %3630 = vmatprep.subr.bf16.mxu0 %v5569_v21  ;;  %v5659_v20 = vld [vmem:[#allocation11 + $0xc8] sm:$0xff]  }
 0x2d0   : > { %3759 = vmatprep.subr.bf16.mxu1 %v5572_v22  ;;  %v5660_v21 = vld [vmem:[#allocation11 + $0x8] sm:$0xff]  }
 0x2d1   : > { %v5661_v22 = vld [vmem:[#allocation11 + $0x88] sm:$0xff]  }
 0x2d2   : > { %3631 = vmatpush1.bf16.msra.mxu0 %v5567_v23  ;;  %v5662_v23 = vld [vmem:[#allocation11 + $0x50] sm:$0xff]  }
 0x2d3   : > { %3760 = vmatpush1.bf16.msra.mxu1 %v5570_v24  ;;  %3632 = vmatprep.subr.bf16.mxu0 %v5575_v25  ;;  %v5663_v24 = vld [vmem:[#allocation11 + $0xd0] sm:$0xff]  }
 0x2d4   : > { %3761 = vmatprep.subr.bf16.mxu1 %v5578_v26  ;;  %v5664_v25 = vld [vmem:[#allocation11 + $0x10] sm:$0xff]  }
 0x2d5   : > { %v5665_v26 = vld [vmem:[#allocation11 + $0x90] sm:$0xff]  }
 0x2d6   : > { %3633 = vmatpush1.bf16.msra.mxu0 %v5573_v27  ;;  %v5666_v27 = vld [vmem:[#allocation11 + $0x58] sm:$0xff]  }
 0x2d7   : > { %3762 = vmatpush1.bf16.msra.mxu1 %v5576_v28  ;;  %3634 = vmatprep.subr.bf16.mxu0 %v5581_v29  ;;  %v5667_v28 = vld [vmem:[#allocation11 + $0xd8] sm:$0xff]  }
 0x2d8   : > { %3763 = vmatprep.subr.bf16.mxu1 %v5584_v30  ;;  %v5668_v29 = vld [vmem:[#allocation11 + $0x18] sm:$0xff]  }
 0x2d9   : > { %v5669_v30 = vld [vmem:[#allocation11 + $0x98] sm:$0xff]  }
 0x2da   : > { %3635 = vmatpush1.bf16.msra.mxu0 %v5579_v31  ;;  %v5670_v31 = vld [vmem:[#allocation11 + $0x60] sm:$0xff]  }
 0x2db   : > { %3764 = vmatpush1.bf16.msra.mxu1 %v5582_v32  ;;  %3636 = vmatprep.subr.bf16.mxu0 %v5587_v33  ;;  %v5671_v32 = vld [vmem:[#allocation11 + $0xe0] sm:$0xff]  }
 0x2dc   : > { %3765 = vmatprep.subr.bf16.mxu1 %v5590_v34  ;;  %v5672_v33 = vld [vmem:[#allocation11 + $0x20] sm:$0xff]  }
 0x2dd   : > { %v5673_v34 = vld [vmem:[#allocation11 + $0xa0] sm:$0xff]  }
 0x2de   : > { %3637 = vmatpush1.bf16.msra.mxu0 %v5585_v36  ;;  %v5674_v36 = vld [vmem:[#allocation11 + $0x68] sm:$0xff]  }
 0x2df   : > { %3766 = vmatpush1.bf16.msra.mxu1 %v5588_v37  ;;  %3638 = vmatprep.subr.bf16.mxu0 %v5593_v38  ;;  %v5675_v37 = vld [vmem:[#allocation11 + $0xe8] sm:$0xff]  }
 0x2e0   : > { %3767 = vmatprep.subr.bf16.mxu1 %v5596_v39  ;;  %v5676_v38 = vld [vmem:[#allocation11 + $0x28] sm:$0xff]  }
 0x2e1   : > { %v5677_v39 = vld [vmem:[#allocation11 + $0xa8] sm:$0xff]  }
 0x2e2   : > { %3639 = vmatpush1.bf16.msra.mxu0 %v5591_v40  ;;  %v5678_v40 = vld [vmem:[#allocation11 + $0x70] sm:$0xff]  }
 0x2e3   : > { %3768 = vmatpush1.bf16.msra.mxu1 %v5594_v42  ;;  %3640 = vmatprep.subr.bf16.mxu0 %v5599_v43  ;;  %v5679_v42 = vld [vmem:[#allocation11 + $0xf0] sm:$0xff]  }
 0x2e4   : > { %3769 = vmatprep.subr.bf16.mxu1 %v5602_v44  ;;  %v5680_v43 = vld [vmem:[#allocation11 + $0x30] sm:$0xff]  }
 0x2e5   : > { %v5681_v44 = vld [vmem:[#allocation11 + $0xb0] sm:$0xff]  }
 0x2e6   : > { %3641 = vmatpush1.bf16.msra.mxu0 %v5597_v45  ;;  %v5682_v45 = vld [vmem:[#allocation11 + $0x78] sm:$0xff]  }
 0x2e7   : > { %3770 = vmatpush1.bf16.msra.mxu1 %v5600_v46  ;;  %3642 = vmatprep.subr.bf16.mxu0 %v5605_v47  ;;  %v5683_v46 = vld [vmem:[#allocation11 + $0xf8] sm:$0xff]  }
 0x2e8   : > { %3771 = vmatprep.subr.bf16.mxu1 %v5608_v48  ;;  %v5684_v47 = vld [vmem:[#allocation11 + $0x38] sm:$0xff]  }
 0x2e9   : > { %v5685_v48 = vld [vmem:[#allocation11 + $0xb8] sm:$0xff]  }
 0x2ea   : > { %3643 = vmatpush1.bf16.msra.mxu0 %v5603_v49  ;;  %v3802_v49 = vsub.s32 0, %v6205_v19 }
 0x2eb   : > { %3772 = vmatpush1.bf16.msra.mxu1 %v5606_v50  ;;  %3644 = vmatprep.subr.bf16.mxu0 %v5611_v51  ;;  %v3798_v50 = vld [vmem:[%s6332_s6] sm:$0xf]  ;;  %v3810_v51 = vsub.s32 2, %v6205_v19 }
 0x2ec   : > { %3773 = vmatprep.subr.bf16.mxu1 %v5614_v52  ;;  %v3806_v52 = vsub.s32 1, %v6205_v19 }
 0x2ee   : > { %3645 = vmatpush1.bf16.msra.mxu0 %v5609_v53  ;;  %v3814_v53 = vsub.s32 3, %v6205_v19 }
 0x2ef   : > { %3774 = vmatpush1.bf16.msra.mxu1 %v5612_v54  ;;  %3646 = vmatprep.subr.bf16.mxu0 %v5617_v55  ;;  %v3803_v54 = vrot.slane %v3798_v50, %v3802_v49  ;;  %v3811_v55 = vrot.slane %v3798_v50, %v3810_v51 }
 0x2f0   : > { %3775 = vmatprep.subr.bf16.mxu1 %v5620_v56  ;;  %v3807_v56 = vrot.slane %v3798_v50, %v3806_v52 }
 0x2f2   : > { %3647 = vmatpush1.bf16.msra.mxu0 %v5615_v57  ;;  %v3815_v57 = vrot.slane %v3798_v50, %v3814_v53 }
 0x2f3   : > { %3776 = vmatpush1.bf16.msra.mxu1 %v5618_v58  ;;  %3648 = vmatprep.subr.bf16.mxu0 %v5623_v59 }
 0x2f4   : > { %3777 = vmatprep.subr.bf16.mxu1 %v5626_v60 }
 0x2f6   : > { %3649 = vmatpush1.bf16.msra.mxu0 %v5621_v61 }
 0x2f7   : > { %3778 = vmatpush1.bf16.msra.mxu1 %v5624_v62  ;;  %3650 = vmatprep.subr.bf16.mxu0 %v5629_v63 }
 0x2f8   : > { %3779 = vmatprep.subr.bf16.mxu1 %v5632_v0 }
 0x2fa   : > { %3651 = vmatpush1.bf16.msra.mxu0 %v5627_v1 }
 0x2fb   : > { %3780 = vmatpush1.bf16.msra.mxu1 %v5630_v2  ;;  %3652 = vmatprep.subr.bf16.mxu0 %v5635_v3 }
 0x2fc   : > { %3781 = vmatprep.subr.bf16.mxu1 %v5638_v4 }
 0x2fe   : > { %3653 = vmatpush1.bf16.msra.mxu0 %v5633_v5 }
 0x2ff   : > { %3782 = vmatpush1.bf16.msra.mxu1 %v5636_v6  ;;  %3654 = vmatprep.subr.bf16.mxu0 %v5641_v7 }
 0x300   : > { %3783 = vmatprep.subr.bf16.mxu1 %v5644_v8 }
 0x302   : > { %3655 = vmatpush1.bf16.msra.mxu0 %v5639_v9 }
 0x303   : > { %3784 = vmatpush1.bf16.msra.mxu1 %v5642_v10  ;;  %3656 = vmatprep.subr.bf16.mxu0 %v5647_v11 }
 0x304   : > { %3785 = vmatprep.subr.bf16.mxu1 %v5650_v12 }
 0x306   : > { %3657 = vmatpush1.bf16.msra.mxu0 %v5645_v13 }
 0x307   : > { %3786 = vmatpush1.bf16.msra.mxu1 %v5648_v14  ;;  %4810 = vmatprep.subr.bf16.mxu0 %v5654_v41 }
 0x308   : > { %4832 = vmatprep.subr.bf16.mxu1 %v5655_v15 }
 0x309   : > { %3659 = vmatmul.mubr.bf16.vlgmr.msra.gmra.mrb[0].mxu0 %v5651_v35 }
 0x30a   : > { %3788 = vmatmul.mubr.bf16.vlgmr.msra.gmra.mrb[0].mxu1 %v5651_v35  ;;  %4811 = vmatpush3.bf16.msra.mxu0 %v5656_v16 }
 0x30b   : > { %4833 = vmatpush3.bf16.msra.mxu1 %v5657_v17  ;;  %4812 = vmatprep.subr.bf16.mxu0 %v5658_v18 }
 0x30c   : > { %4834 = vmatprep.subr.bf16.mxu1 %v5659_v20 }
 0x30e   : > { %4813 = vmatpush3.bf16.msra.mxu0 %v5660_v21 }
 0x30f   : > { %4835 = vmatpush3.bf16.msra.mxu1 %v5661_v22  ;;  %4814 = vmatprep.subr.bf16.mxu0 %v5662_v23  ;;  %v4773_v22 = vld [vmem:[%s6358_s26] ss:$0 sm:$0xff] }
 0x310   : > { %4836 = vmatprep.subr.bf16.mxu1 %v5663_v24 }
 0x312   : > { %4815 = vmatpush3.bf16.msra.mxu0 %v5664_v25 }
 0x313   : > { %4837 = vmatpush3.bf16.msra.mxu1 %v5665_v26  ;;  %4816 = vmatprep.subr.bf16.mxu0 %v5666_v27 }
 0x314   : > { %4838 = vmatprep.subr.bf16.mxu1 %v5667_v28 }
 0x316   : > { %4817 = vmatpush3.bf16.msra.mxu0 %v5668_v29 }
 0x317   : > { %4839 = vmatpush3.bf16.msra.mxu1 %v5669_v30  ;;  %4818 = vmatprep.subr.bf16.mxu0 %v5670_v31 }
 0x318   : > { %4840 = vmatprep.subr.bf16.mxu1 %v5671_v32 }
 0x31a   : > { %4819 = vmatpush3.bf16.msra.mxu0 %v5672_v33 }
 0x31b   : > { %4841 = vmatpush3.bf16.msra.mxu1 %v5673_v34  ;;  %4820 = vmatprep.subr.bf16.mxu0 %v5674_v36 }
 0x31c   : > { %4842 = vmatprep.subr.bf16.mxu1 %v5675_v37 }
 0x31e   : > { %4821 = vmatpush3.bf16.msra.mxu0 %v5676_v38 }
 0x31f   : > { %4843 = vmatpush3.bf16.msra.mxu1 %v5677_v39  ;;  %4822 = vmatprep.subr.bf16.mxu0 %v5678_v40 }
 0x320   : > { %4844 = vmatprep.subr.bf16.mxu1 %v5679_v42 }
 0x322   : > { %4823 = vmatpush3.bf16.msra.mxu0 %v5680_v43 }
 0x323   : > { %4845 = vmatpush3.bf16.msra.mxu1 %v5681_v44  ;;  %4824 = vmatprep.subr.bf16.mxu0 %v5682_v45 }
 0x324   : > { %4846 = vmatprep.subr.bf16.mxu1 %v5683_v46 }
 0x326   : > { %4825 = vmatpush3.bf16.msra.mxu0 %v5684_v47 }
 0x327   : > { %4847 = vmatpush3.bf16.msra.mxu1 %v5685_v48 }
 0x3dc   : > { %v3660_v58 = vpop.f32.mrb[0].mxu0 }
 0x3dd   : > { %v3820_v59 = vadd.f32 %v3803_v54, %v3660_v58  ;;  %v3789_v60 = vpop.f32.mrb[0].mxu1  ;;  %v3662_v61 = vpop.f32.mrb[1].mxu0 }
 0x3de   : > { %v3822_v62 = vadd.f32 %v3811_v55, %v3789_v60  ;;  %v3821_v63 = vadd.f32 %v3807_v56, %v3662_v61  ;;  %v3791_v0 = vpop.f32.mrb[1].mxu1  ;;  %v3664_v1 = vpop.f32.mrb[2].mxu0 }
 0x3df   : > { %v3823_v2 = vadd.f32 %v3815_v57, %v3791_v0  ;;  %v3824_v3 = vadd.f32 %v3803_v54, %v3664_v1  ;;  %v3793_v4 = vpop.f32.mrb[2].mxu1  ;;  %v3666_v5 = vpop.f32.mrb[3].mxu0  ;;  %v3828_v19 = vmax.f32 %v3820_v59, 0.0 }
 0x3e0   : > { %v3826_v6 = vadd.f32 %v3811_v55, %v3793_v4  ;;  %v3825_v7 = vadd.f32 %v3807_v56, %v3666_v5  ;;  %v3795_v8 = vpop.f32.mrb[3].mxu1  ;;  %v3830_v11 = vmax.f32 %v3822_v62, 0.0  ;;  %v3829_v12 = vmax.f32 %v3821_v63, 0.0 }
 0x3e1   : > { %v3832_v9 = vmax.f32 %v3824_v3, 0.0  ;;  %v3827_v10 = vadd.f32 %v3815_v57, %v3795_v8  ;;  %v3831_v41 = vmax.f32 %v3823_v2, 0.0 }
 0x3e2   : > { %v3834_v13 = vmax.f32 %v3826_v6, 0.0  ;;  %v3833_v14 = vmax.f32 %v3825_v7, 0.0 }
 0x3e3   : > { %v3836_v15 = vpack.c.bf16 %v3832_v9, %v3828_v19  ;;  %v3835_v35 = vmax.f32 %v3827_v10, 0.0 }
 0x3e4   : > { %v3838_v16 = vpack.c.bf16 %v3834_v13, %v3830_v11  ;;  %v3837_v17 = vpack.c.bf16 %v3833_v14, %v3829_v12 }
 0x3e5   : > { %v3839_v18 = vpack.c.bf16 %v3835_v35, %v3831_v41 }
 0x3e6   : > { %4135 = vmatprep.mubr.bf16.mxu0 %v3837_v17 }
 0x3e7   : > { %4176 = vmatprep.mubr.bf16.mxu1 %v3839_v18  ;;  %4136 = vmatmul.mubr.bf16.vlgmr.msra.gmra.mrb[4].mxu0 %v3836_v15 }
 0x3e8   : > { %4177 = vmatmul.mubr.bf16.vlgmr.msra.gmra.mrb[4].mxu1 %v3838_v16 }
 0x4ba   : > { %v4826_v20 = vpop.f32.mrb[4].mxu0 }
 0x4bb   : > { %v4848_v21 = vpop.f32.mrb[4].mxu1  ;;  %v4827_v23 = vpop.f32.mrb[5].mxu0 }
 0x4bc   : > { %v4828_v24 = vadd.f32 %v4827_v23, %v4826_v20  ;;  %v4849_v25 = vpop.f32.mrb[5].mxu1  ;;  %v4829_v26 = vpop.f32.mrb[6].mxu0 }
 0x4bd   : > { %v4850_v27 = vadd.f32 %v4849_v25, %v4848_v21  ;;  %v4851_v28 = vpop.f32.mrb[6].mxu1  ;;  %v4830_v29 = vpop.f32.mrb[7].mxu0 }
 0x4be   : > { %v4138_v30 = vadd.f32 %v4828_v24, %v4773_v22  ;;  %v4831_v31 = vadd.f32 %v4830_v29, %v4829_v26  ;;  %v4852_v32 = vpop.f32.mrb[7].mxu1 }
 0x4bf   : > { %v4853_v33 = vadd.f32 %v4852_v32, %v4851_v28 }
 0x4c0   : > { %v4141_v34 = vadd.f32 %v4831_v31, %v4773_v22  ;;  %v4179_v36 = vadd.f32 %v4850_v27, %v4138_v30 }
 0x4c2   : > { %4185 = vmax.xlane.f32.xlu1 %v4179_v36  ;;  %v4182_v37 = vadd.f32 %v4853_v33, %v4141_v34 }
 0x4c6   : > { %4187 = vmax.xlane.f32.xlu1 %v4182_v37 }
 0x54f   : > { %v4186_v38 = vpop.xlane.xlu1 %4185 }
 0x550   : > { %v4189_v39 = vsub.f32 %v4179_v36, %v4186_v38 }
 0x552   : > { %v4191_v40 = vmul.f32 1.442695, %v4189_v39 }
 0x553   : > { %v4188_v42 = vpop.xlane.xlu1 %4187 }
 0x554   : > { %5686 = vpow2.f32 %v4191_v40  ;;  %v4190_v43 = vsub.f32 %v4182_v37, %v4188_v42 }
 0x556   : > { %v4193_v44 = vmul.f32 1.442695, %v4190_v43 }
 0x558   : > { %5688 = vpow2.f32 %v4193_v44 }
 0x55e   : > { %v5687_v45 = vpop.eup %5686 }
 0x55f   : > { %4195 = vadd.xlane.f32.xlu0 %v5687_v45 }
 0x562   : > { %v5689_v46 = vpop.eup %5688 }
 0x563   : > { %4197 = vadd.xlane.f32.xlu1 %v5689_v46 }
 0x5ec   : > { %v4196_v47 = vpop.xlane.xlu0 %4195 }
 0x5ed   : > { %5690 = vrcp.f32 %v4196_v47 }
 0x5f0   : > { %v4198_v48 = vpop.xlane.xlu1 %4197 }
 0x5f1   : > { %5692 = vrcp.f32 %v4198_v48 }
 0x5f7   : > { %v5691_v49 = vpop.eup %5690 }
 0x5f8   : > { %v4200_v50 = vmul.f32 %v5691_v49, %v5687_v45 }
 0x5fa   : > { %4203 = vst [vmem:[#allocation12] sm:$0xff] %v4200_v50 }
 0x5fb   : > { %v5693_v51 = vpop.eup %5692 }
 0x5fc   : > { %v4202_v52 = vmul.f32 %v5693_v51, %v5689_v46 }
 0x5fe   : > { %4204 = vst [vmem:[#allocation12 + $0x8] sm:$0xff] %v4202_v52 }
 0x5ff PF: > { %p4945_p6 = scmp.eq.s32.totalorder %s5997_s13, 1  ;;  %s5925_s30 = smov [#allocation12]  }
 0x600   : > { %s4211_s21 = sshll.u32 %s5925_s30, 4  ;;  %s4212_s21 = int_to_ptr.vmem [resolvable:$true] %s4211_s21 }
 0x601   : > { %s5836_s9 = scalar_lea.vmem %s4212_s21, 256  ;;  %p5843_p2 = scmp.lt.s32.totalorder %s4212_s21, %s4212_s21 }
 0x602   : > { %p5837_p8 = scmp.ne.s32.totalorder %s4212_s21, %s5836_s9  ;;  %p5844_p11 = scmp.lt.s32.totalorder %s5836_s9, %s5836_s9 }
 0x604   : > { %p5838_p12 = pnand %p5837_p8, %p4945_p6  ;;  %p5845_p13 = por %p5844_p11, %p5843_p2 }
 0x606   : > { %p5839_p0 = pneg %p5838_p12 }
 0x608   : > { %p5846_p3 = pnand %p5845_p13, %p5839_p0 }
 0x60a   : > { %5849 = shalt.err (!%p5846_p3)
}
 0x60b   : > { %s6359_s16 = sld [smem:[#allocation18_spill]] }
 0x611   : > { %s5850_s18 = scalar_lea.hbm %s6359_s16, 256 }
 0x612   : > { %p5851_p9 = scmp.ne.s32.totalorder %s6359_s16, %s5850_s18  ;;  %p5856_p1 = scmp.lt.u32.totalorder %s5850_s18, %s6359_s16 }
 0x614   : > { %p5852_p7 = pnand %p5851_p9, %p4945_p6 }
 0x616   : > { %p5853_p10 = pneg %p5852_p7 }
 0x618   : > { %p5858_p4 = pnand %p5856_p1, %p5853_p10 }
 0x61a   : > { %5861 = shalt.err (!%p5858_p4)
}
 0x61b   : > { %s5926_s28 = smov 128   ;;  %s5927_s27 = smov 8  }
 0x61c   : > { %4916 = dma.vmem_to_hbm [thread:$0]  (%p4945_p6), %s4212_s21, 256, %s6359_s16, [#allocation5], %s5926_s28, %s5926_s28, %s5927_s27  }
 0x61d   : > { %5891 = dma.done.wait (%p4945_p6), [#allocation5], 256  }
 0x61e   : > { %5893 = vsyncadd (%p4945_p6), [#allocation5], 4294967040 }
 0x61f PF: > { %p22_p5 = scmp.ge.s32.totalorder %s6104_s20, 4   ;;  %s6360_s30 = smov %s5900_s10 }
 0x620   : > { %s6361_s10 = smov %s5904_s11  ;;  %s6362_s11 = smov %s6113_s25 }
 0x621   : > { %s6363_s12 = smov %s6104_s20  ;;  %24 = sbr.rel (!%p22_p5) target bundleno = 9 (0x9), region = 120 }
 0x628   :  { %4227 = vsyncpa [#allocation4], 1 }
 0x629   :  { %4229 = vsyncpa [#allocation4 + $0x1], 1 }
 0x62a   :  { %4230 = vsyncpa [#allocation7], 1 }
 0x62b   :  { %4231 = vsyncpa [#allocation10], 1 }
 0x62c   :  { %4232 = vsyncpa [#allocation5], 1 }
 0x62d   :  { %4234 = vsyncpa [#allocation5 + $0x1], 1 }

</bundles_post_ra>
